<compile_context>
chip_gen: v6e
topology: v6e:2x2x1
jax: 0.10.0
libtpu: 0.0.40
codegen_flags: <defaults>
</compile_context>

<pallas_src>
import math

import jax
import jax.numpy as jnp
from jax.experimental import pallas as pl
from jax.experimental.pallas import tpu as pltpu  # noqa: F401  (kept for scaling knobs)


# ------------------------- fused GRU-stack + Linear kernel -------------------------

def _make_fused_gru_kernel(num_layers, T, B, H, C):
    """Build the fused kernel for a static (num_layers, T, B, H, C) configuration."""
    f32 = jnp.float32
    H3 = 3 * H

    def gru_cell(gi_t, h_prev, w_hh_l, bhh_b):
        # gi_t: (B, 3H) input pre-activation, gate order (r, z, n), input biases folded.
        # bhh_b: (B, 3H) hidden-side bias [0, 0, b_hn] (hoisted broadcast).
        gh = jnp.dot(h_prev, w_hh_l, preferred_element_type=f32) + bhh_b
        r = jax.nn.sigmoid(gi_t[:, 0:H] + gh[:, 0:H])
        z = jax.nn.sigmoid(gi_t[:, H:2 * H] + gh[:, H:2 * H])
        n = jnp.tanh(gi_t[:, 2 * H:H3] + r * gh[:, 2 * H:H3])
        return (1.0 - z) * n + z * h_prev

    def gru_cell_t0(gi_t, bhn_b):
        # h0 == 0: the hidden matmul and the z*h term vanish.
        r = jax.nn.sigmoid(gi_t[:, 0:H])
        z = jax.nn.sigmoid(gi_t[:, H:2 * H])
        n = jnp.tanh(gi_t[:, 2 * H:H3] + r * bhn_b)
        return (1.0 - z) * n

    def kernel(*refs):
        if num_layers > 1:
            (x_ref, wih0_ref, bi0_ref, wih_ref, bi_ref,
             whh_ref, bhh_ref, wout_ref, bout_ref, out_ref) = refs
        else:
            (x_ref, wih0_ref, bi0_ref,
             whh_ref, bhh_ref, wout_ref, bout_ref, out_ref) = refs
            wih_ref = bi_ref = None

        # Layer-0 input projection: one (T*B,F)x(F,3H) MXU pass, independent of the
        # recurrence (time-major rows: row = t*B + b).  Biases already folded.
        gi0 = (jnp.dot(x_ref[...], wih0_ref[...], preferred_element_type=f32)
               + jnp.broadcast_to(bi0_ref[...], (T * B, H3)))

        # Hoist per-layer weights and bias broadcasts out of the unrolled loop.
        w_hh = [whh_ref[l] for l in range(num_layers)]                 # (H, 3H)
        bhh_b = [jnp.broadcast_to(bhh_ref[l], (B, H3)) for l in range(num_layers)]
        bhn_b = [bhh_b[l][:, 2 * H:H3] for l in range(num_layers)]     # (B, H)
        if num_layers > 1:
            w_ih = [wih_ref[l] for l in range(num_layers - 1)]         # (H, 3H)
            bi_b = [jnp.broadcast_to(bi_ref[l], (B, H3))
                    for l in range(num_layers - 1)]

        # Wavefront over (layer, time): layer l runs step t at wave w = t + l.
        # y[l] holds h^l at that layer's most recently processed step.
        y = [None] * num_layers
        for w in range(T + num_layers - 1):
            # Descending layer order: y[l-1] still holds h^{l-1}_{w-l} (written at
            # wave w-1) when layer l consumes it as its step-(w-l) input.
            for l in range(num_layers - 1, -1, -1):
                t = w - l
                if t < 0 or t >= T:
                    continue
                if l == 0:
                    gi_t = gi0[t * B:(t + 1) * B, :]
                else:
                    # Per-step inter-layer projection: one (B,H)x(H,3H) dot.
                    gi_t = (jnp.dot(y[l - 1], w_ih[l - 1],
                                    preferred_element_type=f32) + bi_b[l - 1])
                if t == 0:
                    y[l] = gru_cell_t0(gi_t, bhn_b[l])
                else:
                    y[l] = gru_cell(gi_t, y[l], w_hh[l], bhh_b[l])

        # Fused classifier on the last layer's final hidden state: (B, C).
        out_ref[...] = (jnp.dot(y[num_layers - 1], wout_ref[...],
                                preferred_element_type=f32)
                        + bout_ref[...]).astype(out_ref.dtype)

    return kernel


# --------------------------------- forward pass ------------------------------------

def rnn_forward(x_btf, params):
    """Equivalent of RNN.forward: GRU(num_layers, batch_first) -> out[:, -1] -> Linear."""
    B, T, F = x_btf.shape
    w_hh = params["w_hh"]                     # (L, H, 3H)
    L, H, _ = w_hh.shape
    C = params["w_out_t"].shape[1]

    # Time-major rows (row = t*B + b).  Tiny layout op; gi0 itself is computed
    # inside the kernel so it never round-trips through HBM.
    x_tm = jnp.swapaxes(x_btf, 0, 1).reshape(T * B, F)

    args = [x_tm, params["w_ih0"], params["b_i0"]]
    if L > 1:
        args += [params["w_ih_rest"], params["b_i_rest"]]
    args += [w_hh, params["b_hh"], params["w_out_t"], params["b_out"]]

    return pl.pallas_call(
        _make_fused_gru_kernel(L, T, B, H, C),
        out_shape=jax.ShapeDtypeStruct((B, C), jnp.float32),
    )(*args)


# -------------------------------- parameter setup ----------------------------------

def init_rnn_params(key, input_size, hidden_size, num_layers, num_classes):
    """PyTorch-style uniform(-1/sqrt(H), 1/sqrt(H)) init, repacked gate-concatenated."""
    H = hidden_size
    stdv = 1.0 / math.sqrt(H)

    def uniform(k, shape):
        return jax.random.uniform(k, shape, jnp.float32, -stdv, stdv)

    w_ih0 = b_i0 = None
    w_ih_rest, b_i_rest, w_hh_all, b_hh_all = [], [], [], []

    for layer in range(num_layers):
        in_f = input_size if layer == 0 else H
        key, k1, k2, k3, k4 = jax.random.split(key, 5)
        w_ih = uniform(k1, (3 * H, in_f))     # torch layout, gate order (r, z, n)
        w_hh = uniform(k2, (3 * H, H))
        b_ih = uniform(k3, (3 * H,))
        b_hh = uniform(k4, (3 * H,))

        w_ih_p = w_ih.T                       # (in_f, 3H) = [W_ir^T | W_iz^T | W_in^T]
        w_hh_p = w_hh.T                       # (H,   3H) = [W_hr^T | W_hz^T | W_hn^T]
        # Fold biases: r/z gates see (b_i + b_h) on the input side; b_hn stays on the
        # hidden side (it is multiplied by r inside the cell), packed as [0, 0, b_hn].
        b_i_fold = jnp.concatenate(
            [b_ih[0:H] + b_hh[0:H], b_ih[H:2 * H] + b_hh[H:2 * H], b_ih[2 * H:]])
        b_h_pack = jnp.concatenate(
            [jnp.zeros((2 * H,), jnp.float32), b_hh[2 * H:]])

        if layer == 0:
            w_ih0 = w_ih_p
            b_i0 = b_i_fold.reshape(1, 3 * H)
        else:
            w_ih_rest.append(w_ih_p)
            b_i_rest.append(b_i_fold.reshape(1, 3 * H))
        w_hh_all.append(w_hh_p)
        b_hh_all.append(b_h_pack.reshape(1, 3 * H))

    key, k5, k6 = jax.random.split(key, 3)
    w_out = uniform(k5, (num_classes, H))     # nn.Linear: same 1/sqrt(H) bound
    b_out = uniform(k6, (num_classes,))

    params = {
        "w_ih0": w_ih0,                           # (F, 3H)
        "b_i0": b_i0,                             # (1, 3H)
        "w_hh": jnp.stack(w_hh_all),              # (L, H, 3H)
        "b_hh": jnp.stack(b_hh_all),              # (L, 1, 3H)  = [0, 0, b_hn]
        "w_out_t": w_out.T,                       # (H, C)
        "b_out": b_out.reshape(1, -1),            # (1, C)
    }
    if num_layers > 1:
        params["w_ih_rest"] = jnp.stack(w_ih_rest)    # (L-1, H, 3H)
        params["b_i_rest"] = jnp.stack(b_i_rest)      # (L-1, 1, 3H)
    return params


# -------------------------------------- main ----------------------------------------

if __name__ == "__main__":
    input_size, hidden_size, num_layers, num_classes = 16, 32, 2, 10
    batch, seq = 2, 8

    key = jax.random.PRNGKey(0)
    key, xk = jax.random.split(key)
    x = jax.random.normal(xk, (batch, seq, input_size), jnp.float32)

    params = init_rnn_params(key, input_size, hidden_size, num_layers, num_classes)

    out = jax.jit(rnn_forward)(x, params)
    out = jax.block_until_ready(out)
    assert out.shape == (batch, num_classes)
    assert bool(jnp.isfinite(out).all())
    print("KERNEL_OK")
</pallas_src>

<mosaic_0001>
module attributes {stable_mosaic.version = 11 : i64} {
  func.func @kernel(%arg0: memref<16x16xf32, #tpu.memory_space<vmem>>, %arg1: memref<16x96xf32, #tpu.memory_space<vmem>>, %arg2: memref<1x96xf32, #tpu.memory_space<vmem>>, %arg3: memref<1x32x96xf32, #tpu.memory_space<vmem>>, %arg4: memref<1x1x96xf32, #tpu.memory_space<vmem>>, %arg5: memref<2x32x96xf32, #tpu.memory_space<vmem>>, %arg6: memref<2x1x96xf32, #tpu.memory_space<vmem>>, %arg7: memref<32x10xf32, #tpu.memory_space<vmem>>, %arg8: memref<1x10xf32, #tpu.memory_space<vmem>>, %arg9: memref<2x10xf32, #tpu.memory_space<vmem>>) attributes {dimension_semantics = [], scalar_prefetch = 0 : i64, scratch_operands = 0 : i64, tpu.core_type = #tpu.core_type<tc>} {
    %c0 = arith.constant 0 : index
    %c0_0 = arith.constant 0 : index
    %0 = vector.load %arg0[%c0, %c0_0] : memref<16x16xf32, #tpu.memory_space<vmem>>, vector<16x16xf32>
    %c0_1 = arith.constant 0 : index
    %c0_2 = arith.constant 0 : index
    %1 = vector.load %arg1[%c0_1, %c0_2] : memref<16x96xf32, #tpu.memory_space<vmem>>, vector<16x96xf32>
    %cst = arith.constant dense<0.000000e+00> : vector<16x96xf32>
    %2 = tpu.matmul %0, %1, %cst {dimension_numbers = #tpu.dot_dimension_numbers<[1], [0], [0], [1], [0, 0, 1, 1], [], []>} : vector<16x16xf32>, vector<16x96xf32>, vector<16x96xf32> -> vector<16x96xf32>
    %c0_3 = arith.constant 0 : index
    %c0_4 = arith.constant 0 : index
    %3 = vector.load %arg2[%c0_3, %c0_4] : memref<1x96xf32, #tpu.memory_space<vmem>>, vector<1x96xf32>
    %4 = vector.shape_cast %3 : vector<1x96xf32> to vector<1x96xf32>
    %5 = vector.broadcast %4 : vector<1x96xf32> to vector<16x96xf32>
    %6 = arith.addf %2, %5 : vector<16x96xf32>
    %c0_5 = arith.constant 0 : index
    %c0_6 = arith.constant 0 : index
    %c0_7 = arith.constant 0 : index
    %7 = vector.load %arg5[%c0_5, %c0_6, %c0_7] : memref<2x32x96xf32, #tpu.memory_space<vmem>>, vector<1x32x96xf32>
    %8 = vector.shape_cast %7 : vector<1x32x96xf32> to vector<32x96xf32>
    %c1 = arith.constant 1 : index
    %c0_8 = arith.constant 0 : index
    %c0_9 = arith.constant 0 : index
    %9 = vector.load %arg5[%c1, %c0_8, %c0_9] : memref<2x32x96xf32, #tpu.memory_space<vmem>>, vector<1x32x96xf32>
    %10 = vector.shape_cast %9 : vector<1x32x96xf32> to vector<32x96xf32>
    %c0_10 = arith.constant 0 : index
    %c0_11 = arith.constant 0 : index
    %c0_12 = arith.constant 0 : index
    %11 = vector.load %arg6[%c0_10, %c0_11, %c0_12] : memref<2x1x96xf32, #tpu.memory_space<vmem>>, vector<1x1x96xf32>
    %12 = vector.shape_cast %11 : vector<1x1x96xf32> to vector<1x96xf32>
    %13 = vector.shape_cast %12 : vector<1x96xf32> to vector<1x96xf32>
    %14 = vector.broadcast %13 : vector<1x96xf32> to vector<2x96xf32>
    %c1_13 = arith.constant 1 : index
    %c0_14 = arith.constant 0 : index
    %c0_15 = arith.constant 0 : index
    %15 = vector.load %arg6[%c1_13, %c0_14, %c0_15] : memref<2x1x96xf32, #tpu.memory_space<vmem>>, vector<1x1x96xf32>
    %16 = vector.shape_cast %15 : vector<1x1x96xf32> to vector<1x96xf32>
    %17 = vector.shape_cast %16 : vector<1x96xf32> to vector<1x96xf32>
    %18 = vector.broadcast %17 : vector<1x96xf32> to vector<2x96xf32>
    %19 = vector.extract_strided_slice %14 {offsets = [0, 64], sizes = [2, 32], strides = [1, 1]} : vector<2x96xf32> to vector<2x32xf32>
    %20 = vector.extract_strided_slice %18 {offsets = [0, 64], sizes = [2, 32], strides = [1, 1]} : vector<2x96xf32> to vector<2x32xf32>
    %c0_16 = arith.constant 0 : index
    %c0_17 = arith.constant 0 : index
    %c0_18 = arith.constant 0 : index
    %21 = vector.load %arg3[%c0_16, %c0_17, %c0_18] : memref<1x32x96xf32, #tpu.memory_space<vmem>>, vector<1x32x96xf32>
    %22 = vector.shape_cast %21 : vector<1x32x96xf32> to vector<32x96xf32>
    %c0_19 = arith.constant 0 : index
    %c0_20 = arith.constant 0 : index
    %c0_21 = arith.constant 0 : index
    %23 = vector.load %arg4[%c0_19, %c0_20, %c0_21] : memref<1x1x96xf32, #tpu.memory_space<vmem>>, vector<1x1x96xf32>
    %24 = vector.shape_cast %23 : vector<1x1x96xf32> to vector<1x96xf32>
    %25 = vector.shape_cast %24 : vector<1x96xf32> to vector<1x96xf32>
    %26 = vector.broadcast %25 : vector<1x96xf32> to vector<2x96xf32>
    %27 = vector.extract_strided_slice %6 {offsets = [0, 0], sizes = [2, 96], strides = [1, 1]} : vector<16x96xf32> to vector<2x96xf32>
    %28 = vector.extract_strided_slice %27 {offsets = [0, 0], sizes = [2, 32], strides = [1, 1]} : vector<2x96xf32> to vector<2x32xf32>
    %29 = arith.negf %28 : vector<2x32xf32>
    %30 = math.exp %29 : vector<2x32xf32>
    %cst_22 = arith.constant 1.000000e+00 : f32
    %31 = vector.broadcast %cst_22 : f32 to vector<2x32xf32>
    %32 = arith.addf %31, %30 : vector<2x32xf32>
    %33 = arith.divf %31, %32 : vector<2x32xf32>
    %34 = vector.extract_strided_slice %27 {offsets = [0, 32], sizes = [2, 32], strides = [1, 1]} : vector<2x96xf32> to vector<2x32xf32>
    %35 = arith.negf %34 : vector<2x32xf32>
    %36 = math.exp %35 : vector<2x32xf32>
    %cst_23 = arith.constant 1.000000e+00 : f32
    %37 = vector.broadcast %cst_23 : f32 to vector<2x32xf32>
    %38 = arith.addf %37, %36 : vector<2x32xf32>
    %39 = arith.divf %37, %38 : vector<2x32xf32>
    %40 = vector.extract_strided_slice %27 {offsets = [0, 64], sizes = [2, 32], strides = [1, 1]} : vector<2x96xf32> to vector<2x32xf32>
    %41 = arith.mulf %33, %19 : vector<2x32xf32>
    %42 = arith.addf %40, %41 : vector<2x32xf32>
    %43 = math.tanh %42 : vector<2x32xf32>
    %cst_24 = arith.constant 1.000000e+00 : f32
    %44 = vector.broadcast %cst_24 : f32 to vector<2x32xf32>
    %45 = arith.subf %44, %39 : vector<2x32xf32>
    %46 = arith.mulf %45, %43 : vector<2x32xf32>
    %cst_25 = arith.constant dense<0.000000e+00> : vector<2x96xf32>
    %47 = tpu.matmul %46, %22, %cst_25 {dimension_numbers = #tpu.dot_dimension_numbers<[1], [0], [0], [1], [0, 0, 1, 1], [], []>} : vector<2x32xf32>, vector<32x96xf32>, vector<2x96xf32> -> vector<2x96xf32>
    %48 = arith.addf %47, %26 : vector<2x96xf32>
    %49 = vector.extract_strided_slice %48 {offsets = [0, 0], sizes = [2, 32], strides = [1, 1]} : vector<2x96xf32> to vector<2x32xf32>
    %50 = arith.negf %49 : vector<2x32xf32>
    %51 = math.exp %50 : vector<2x32xf32>
    %cst_26 = arith.constant 1.000000e+00 : f32
    %52 = vector.broadcast %cst_26 : f32 to vector<2x32xf32>
    %53 = arith.addf %52, %51 : vector<2x32xf32>
    %54 = arith.divf %52, %53 : vector<2x32xf32>
    %55 = vector.extract_strided_slice %48 {offsets = [0, 32], sizes = [2, 32], strides = [1, 1]} : vector<2x96xf32> to vector<2x32xf32>
    %56 = arith.negf %55 : vector<2x32xf32>
    %57 = math.exp %56 : vector<2x32xf32>
    %cst_27 = arith.constant 1.000000e+00 : f32
    %58 = vector.broadcast %cst_27 : f32 to vector<2x32xf32>
    %59 = arith.addf %58, %57 : vector<2x32xf32>
    %60 = arith.divf %58, %59 : vector<2x32xf32>
    %61 = vector.extract_strided_slice %48 {offsets = [0, 64], sizes = [2, 32], strides = [1, 1]} : vector<2x96xf32> to vector<2x32xf32>
    %62 = arith.mulf %54, %20 : vector<2x32xf32>
    %63 = arith.addf %61, %62 : vector<2x32xf32>
    %64 = math.tanh %63 : vector<2x32xf32>
    %cst_28 = arith.constant 1.000000e+00 : f32
    %65 = vector.broadcast %cst_28 : f32 to vector<2x32xf32>
    %66 = arith.subf %65, %60 : vector<2x32xf32>
    %67 = arith.mulf %66, %64 : vector<2x32xf32>
    %68 = vector.extract_strided_slice %6 {offsets = [2, 0], sizes = [2, 96], strides = [1, 1]} : vector<16x96xf32> to vector<2x96xf32>
    %cst_29 = arith.constant dense<0.000000e+00> : vector<2x96xf32>
    %69 = tpu.matmul %46, %8, %cst_29 {dimension_numbers = #tpu.dot_dimension_numbers<[1], [0], [0], [1], [0, 0, 1, 1], [], []>} : vector<2x32xf32>, vector<32x96xf32>, vector<2x96xf32> -> vector<2x96xf32>
    %70 = arith.addf %69, %14 : vector<2x96xf32>
    %71 = vector.extract_strided_slice %68 {offsets = [0, 0], sizes = [2, 32], strides = [1, 1]} : vector<2x96xf32> to vector<2x32xf32>
    %72 = vector.extract_strided_slice %70 {offsets = [0, 0], sizes = [2, 32], strides = [1, 1]} : vector<2x96xf32> to vector<2x32xf32>
    %73 = arith.addf %71, %72 : vector<2x32xf32>
    %74 = arith.negf %73 : vector<2x32xf32>
    %75 = math.exp %74 : vector<2x32xf32>
    %cst_30 = arith.constant 1.000000e+00 : f32
    %76 = vector.broadcast %cst_30 : f32 to vector<2x32xf32>
    %77 = arith.addf %76, %75 : vector<2x32xf32>
    %78 = arith.divf %76, %77 : vector<2x32xf32>
    %79 = vector.extract_strided_slice %68 {offsets = [0, 32], sizes = [2, 32], strides = [1, 1]} : vector<2x96xf32> to vector<2x32xf32>
    %80 = vector.extract_strided_slice %70 {offsets = [0, 32], sizes = [2, 32], strides = [1, 1]} : vector<2x96xf32> to vector<2x32xf32>
    %81 = arith.addf %79, %80 : vector<2x32xf32>
    %82 = arith.negf %81 : vector<2x32xf32>
    %83 = math.exp %82 : vector<2x32xf32>
    %cst_31 = arith.constant 1.000000e+00 : f32
    %84 = vector.broadcast %cst_31 : f32 to vector<2x32xf32>
    %85 = arith.addf %84, %83 : vector<2x32xf32>
    %86 = arith.divf %84, %85 : vector<2x32xf32>
    %87 = vector.extract_strided_slice %68 {offsets = [0, 64], sizes = [2, 32], strides = [1, 1]} : vector<2x96xf32> to vector<2x32xf32>
    %88 = vector.extract_strided_slice %70 {offsets = [0, 64], sizes = [2, 32], strides = [1, 1]} : vector<2x96xf32> to vector<2x32xf32>
    %89 = arith.mulf %78, %88 : vector<2x32xf32>
    %90 = arith.addf %87, %89 : vector<2x32xf32>
    %91 = math.tanh %90 : vector<2x32xf32>
    %cst_32 = arith.constant 1.000000e+00 : f32
    %92 = vector.broadcast %cst_32 : f32 to vector<2x32xf32>
    %93 = arith.subf %92, %86 : vector<2x32xf32>
    %94 = arith.mulf %93, %91 : vector<2x32xf32>
    %95 = arith.mulf %86, %46 : vector<2x32xf32>
    %96 = arith.addf %94, %95 : vector<2x32xf32>
    %cst_33 = arith.constant dense<0.000000e+00> : vector<2x96xf32>
    %97 = tpu.matmul %96, %22, %cst_33 {dimension_numbers = #tpu.dot_dimension_numbers<[1], [0], [0], [1], [0, 0, 1, 1], [], []>} : vector<2x32xf32>, vector<32x96xf32>, vector<2x96xf32> -> vector<2x96xf32>
    %98 = arith.addf %97, %26 : vector<2x96xf32>
    %cst_34 = arith.constant dense<0.000000e+00> : vector<2x96xf32>
    %99 = tpu.matmul %67, %10, %cst_34 {dimension_numbers = #tpu.dot_dimension_numbers<[1], [0], [0], [1], [0, 0, 1, 1], [], []>} : vector<2x32xf32>, vector<32x96xf32>, vector<2x96xf32> -> vector<2x96xf32>
    %100 = arith.addf %99, %18 : vector<2x96xf32>
    %101 = vector.extract_strided_slice %98 {offsets = [0, 0], sizes = [2, 32], strides = [1, 1]} : vector<2x96xf32> to vector<2x32xf32>
    %102 = vector.extract_strided_slice %100 {offsets = [0, 0], sizes = [2, 32], strides = [1, 1]} : vector<2x96xf32> to vector<2x32xf32>
    %103 = arith.addf %101, %102 : vector<2x32xf32>
    %104 = arith.negf %103 : vector<2x32xf32>
    %105 = math.exp %104 : vector<2x32xf32>
    %cst_35 = arith.constant 1.000000e+00 : f32
    %106 = vector.broadcast %cst_35 : f32 to vector<2x32xf32>
    %107 = arith.addf %106, %105 : vector<2x32xf32>
    %108 = arith.divf %106, %107 : vector<2x32xf32>
    %109 = vector.extract_strided_slice %98 {offsets = [0, 32], sizes = [2, 32], strides = [1, 1]} : vector<2x96xf32> to vector<2x32xf32>
    %110 = vector.extract_strided_slice %100 {offsets = [0, 32], sizes = [2, 32], strides = [1, 1]} : vector<2x96xf32> to vector<2x32xf32>
    %111 = arith.addf %109, %110 : vector<2x32xf32>
    %112 = arith.negf %111 : vector<2x32xf32>
    %113 = math.exp %112 : vector<2x32xf32>
    %cst_36 = arith.constant 1.000000e+00 : f32
    %114 = vector.broadcast %cst_36 : f32 to vector<2x32xf32>
    %115 = arith.addf %114, %113 : vector<2x32xf32>
    %116 = arith.divf %114, %115 : vector<2x32xf32>
    %117 = vector.extract_strided_slice %98 {offsets = [0, 64], sizes = [2, 32], strides = [1, 1]} : vector<2x96xf32> to vector<2x32xf32>
    %118 = vector.extract_strided_slice %100 {offsets = [0, 64], sizes = [2, 32], strides = [1, 1]} : vector<2x96xf32> to vector<2x32xf32>
    %119 = arith.mulf %108, %118 : vector<2x32xf32>
    %120 = arith.addf %117, %119 : vector<2x32xf32>
    %121 = math.tanh %120 : vector<2x32xf32>
    %cst_37 = arith.constant 1.000000e+00 : f32
    %122 = vector.broadcast %cst_37 : f32 to vector<2x32xf32>
    %123 = arith.subf %122, %116 : vector<2x32xf32>
    %124 = arith.mulf %123, %121 : vector<2x32xf32>
    %125 = arith.mulf %116, %67 : vector<2x32xf32>
    %126 = arith.addf %124, %125 : vector<2x32xf32>
    %127 = vector.extract_strided_slice %6 {offsets = [4, 0], sizes = [2, 96], strides = [1, 1]} : vector<16x96xf32> to vector<2x96xf32>
    %cst_38 = arith.constant dense<0.000000e+00> : vector<2x96xf32>
    %128 = tpu.matmul %96, %8, %cst_38 {dimension_numbers = #tpu.dot_dimension_numbers<[1], [0], [0], [1], [0, 0, 1, 1], [], []>} : vector<2x32xf32>, vector<32x96xf32>, vector<2x96xf32> -> vector<2x96xf32>
    %129 = arith.addf %128, %14 : vector<2x96xf32>
    %130 = vector.extract_strided_slice %127 {offsets = [0, 0], sizes = [2, 32], strides = [1, 1]} : vector<2x96xf32> to vector<2x32xf32>
    %131 = vector.extract_strided_slice %129 {offsets = [0, 0], sizes = [2, 32], strides = [1, 1]} : vector<2x96xf32> to vector<2x32xf32>
    %132 = arith.addf %130, %131 : vector<2x32xf32>
    %133 = arith.negf %132 : vector<2x32xf32>
    %134 = math.exp %133 : vector<2x32xf32>
    %cst_39 = arith.constant 1.000000e+00 : f32
    %135 = vector.broadcast %cst_39 : f32 to vector<2x32xf32>
    %136 = arith.addf %135, %134 : vector<2x32xf32>
    %137 = arith.divf %135, %136 : vector<2x32xf32>
    %138 = vector.extract_strided_slice %127 {offsets = [0, 32], sizes = [2, 32], strides = [1, 1]} : vector<2x96xf32> to vector<2x32xf32>
    %139 = vector.extract_strided_slice %129 {offsets = [0, 32], sizes = [2, 32], strides = [1, 1]} : vector<2x96xf32> to vector<2x32xf32>
    %140 = arith.addf %138, %139 : vector<2x32xf32>
    %141 = arith.negf %140 : vector<2x32xf32>
    %142 = math.exp %141 : vector<2x32xf32>
    %cst_40 = arith.constant 1.000000e+00 : f32
    %143 = vector.broadcast %cst_40 : f32 to vector<2x32xf32>
    %144 = arith.addf %143, %142 : vector<2x32xf32>
    %145 = arith.divf %143, %144 : vector<2x32xf32>
    %146 = vector.extract_strided_slice %127 {offsets = [0, 64], sizes = [2, 32], strides = [1, 1]} : vector<2x96xf32> to vector<2x32xf32>
    %147 = vector.extract_strided_slice %129 {offsets = [0, 64], sizes = [2, 32], strides = [1, 1]} : vector<2x96xf32> to vector<2x32xf32>
    %148 = arith.mulf %137, %147 : vector<2x32xf32>
    %149 = arith.addf %146, %148 : vector<2x32xf32>
    %150 = math.tanh %149 : vector<2x32xf32>
    %cst_41 = arith.constant 1.000000e+00 : f32
    %151 = vector.broadcast %cst_41 : f32 to vector<2x32xf32>
    %152 = arith.subf %151, %145 : vector<2x32xf32>
    %153 = arith.mulf %152, %150 : vector<2x32xf32>
    %154 = arith.mulf %145, %96 : vector<2x32xf32>
    %155 = arith.addf %153, %154 : vector<2x32xf32>
    %cst_42 = arith.constant dense<0.000000e+00> : vector<2x96xf32>
    %156 = tpu.matmul %155, %22, %cst_42 {dimension_numbers = #tpu.dot_dimension_numbers<[1], [0], [0], [1], [0, 0, 1, 1], [], []>} : vector<2x32xf32>, vector<32x96xf32>, vector<2x96xf32> -> vector<2x96xf32>
    %157 = arith.addf %156, %26 : vector<2x96xf32>
    %cst_43 = arith.constant dense<0.000000e+00> : vector<2x96xf32>
    %158 = tpu.matmul %126, %10, %cst_43 {dimension_numbers = #tpu.dot_dimension_numbers<[1], [0], [0], [1], [0, 0, 1, 1], [], []>} : vector<2x32xf32>, vector<32x96xf32>, vector<2x96xf32> -> vector<2x96xf32>
    %159 = arith.addf %158, %18 : vector<2x96xf32>
    %160 = vector.extract_strided_slice %157 {offsets = [0, 0], sizes = [2, 32], strides = [1, 1]} : vector<2x96xf32> to vector<2x32xf32>
    %161 = vector.extract_strided_slice %159 {offsets = [0, 0], sizes = [2, 32], strides = [1, 1]} : vector<2x96xf32> to vector<2x32xf32>
    %162 = arith.addf %160, %161 : vector<2x32xf32>
    %163 = arith.negf %162 : vector<2x32xf32>
    %164 = math.exp %163 : vector<2x32xf32>
    %cst_44 = arith.constant 1.000000e+00 : f32
    %165 = vector.broadcast %cst_44 : f32 to vector<2x32xf32>
    %166 = arith.addf %165, %164 : vector<2x32xf32>
    %167 = arith.divf %165, %166 : vector<2x32xf32>
    %168 = vector.extract_strided_slice %157 {offsets = [0, 32], sizes = [2, 32], strides = [1, 1]} : vector<2x96xf32> to vector<2x32xf32>
    %169 = vector.extract_strided_slice %159 {offsets = [0, 32], sizes = [2, 32], strides = [1, 1]} : vector<2x96xf32> to vector<2x32xf32>
    %170 = arith.addf %168, %169 : vector<2x32xf32>
    %171 = arith.negf %170 : vector<2x32xf32>
    %172 = math.exp %171 : vector<2x32xf32>
    %cst_45 = arith.constant 1.000000e+00 : f32
    %173 = vector.broadcast %cst_45 : f32 to vector<2x32xf32>
    %174 = arith.addf %173, %172 : vector<2x32xf32>
    %175 = arith.divf %173, %174 : vector<2x32xf32>
    %176 = vector.extract_strided_slice %157 {offsets = [0, 64], sizes = [2, 32], strides = [1, 1]} : vector<2x96xf32> to vector<2x32xf32>
    %177 = vector.extract_strided_slice %159 {offsets = [0, 64], sizes = [2, 32], strides = [1, 1]} : vector<2x96xf32> to vector<2x32xf32>
    %178 = arith.mulf %167, %177 : vector<2x32xf32>
    %179 = arith.addf %176, %178 : vector<2x32xf32>
    %180 = math.tanh %179 : vector<2x32xf32>
    %cst_46 = arith.constant 1.000000e+00 : f32
    %181 = vector.broadcast %cst_46 : f32 to vector<2x32xf32>
    %182 = arith.subf %181, %175 : vector<2x32xf32>
    %183 = arith.mulf %182, %180 : vector<2x32xf32>
    %184 = arith.mulf %175, %126 : vector<2x32xf32>
    %185 = arith.addf %183, %184 : vector<2x32xf32>
    %186 = vector.extract_strided_slice %6 {offsets = [6, 0], sizes = [2, 96], strides = [1, 1]} : vector<16x96xf32> to vector<2x96xf32>
    %cst_47 = arith.constant dense<0.000000e+00> : vector<2x96xf32>
    %187 = tpu.matmul %155, %8, %cst_47 {dimension_numbers = #tpu.dot_dimension_numbers<[1], [0], [0], [1], [0, 0, 1, 1], [], []>} : vector<2x32xf32>, vector<32x96xf32>, vector<2x96xf32> -> vector<2x96xf32>
    %188 = arith.addf %187, %14 : vector<2x96xf32>
    %189 = vector.extract_strided_slice %186 {offsets = [0, 0], sizes = [2, 32], strides = [1, 1]} : vector<2x96xf32> to vector<2x32xf32>
    %190 = vector.extract_strided_slice %188 {offsets = [0, 0], sizes = [2, 32], strides = [1, 1]} : vector<2x96xf32> to vector<2x32xf32>
    %191 = arith.addf %189, %190 : vector<2x32xf32>
    %192 = arith.negf %191 : vector<2x32xf32>
    %193 = math.exp %192 : vector<2x32xf32>
    %cst_48 = arith.constant 1.000000e+00 : f32
    %194 = vector.broadcast %cst_48 : f32 to vector<2x32xf32>
    %195 = arith.addf %194, %193 : vector<2x32xf32>
    %196 = arith.divf %194, %195 : vector<2x32xf32>
    %197 = vector.extract_strided_slice %186 {offsets = [0, 32], sizes = [2, 32], strides = [1, 1]} : vector<2x96xf32> to vector<2x32xf32>
    %198 = vector.extract_strided_slice %188 {offsets = [0, 32], sizes = [2, 32], strides = [1, 1]} : vector<2x96xf32> to vector<2x32xf32>
    %199 = arith.addf %197, %198 : vector<2x32xf32>
    %200 = arith.negf %199 : vector<2x32xf32>
    %201 = math.exp %200 : vector<2x32xf32>
    %cst_49 = arith.constant 1.000000e+00 : f32
    %202 = vector.broadcast %cst_49 : f32 to vector<2x32xf32>
    %203 = arith.addf %202, %201 : vector<2x32xf32>
    %204 = arith.divf %202, %203 : vector<2x32xf32>
    %205 = vector.extract_strided_slice %186 {offsets = [0, 64], sizes = [2, 32], strides = [1, 1]} : vector<2x96xf32> to vector<2x32xf32>
    %206 = vector.extract_strided_slice %188 {offsets = [0, 64], sizes = [2, 32], strides = [1, 1]} : vector<2x96xf32> to vector<2x32xf32>
    %207 = arith.mulf %196, %206 : vector<2x32xf32>
    %208 = arith.addf %205, %207 : vector<2x32xf32>
    %209 = math.tanh %208 : vector<2x32xf32>
    %cst_50 = arith.constant 1.000000e+00 : f32
    %210 = vector.broadcast %cst_50 : f32 to vector<2x32xf32>
    %211 = arith.subf %210, %204 : vector<2x32xf32>
    %212 = arith.mulf %211, %209 : vector<2x32xf32>
    %213 = arith.mulf %204, %155 : vector<2x32xf32>
    %214 = arith.addf %212, %213 : vector<2x32xf32>
    %cst_51 = arith.constant dense<0.000000e+00> : vector<2x96xf32>
    %215 = tpu.matmul %214, %22, %cst_51 {dimension_numbers = #tpu.dot_dimension_numbers<[1], [0], [0], [1], [0, 0, 1, 1], [], []>} : vector<2x32xf32>, vector<32x96xf32>, vector<2x96xf32> -> vector<2x96xf32>
    %216 = arith.addf %215, %26 : vector<2x96xf32>
    %cst_52 = arith.constant dense<0.000000e+00> : vector<2x96xf32>
    %217 = tpu.matmul %185, %10, %cst_52 {dimension_numbers = #tpu.dot_dimension_numbers<[1], [0], [0], [1], [0, 0, 1, 1], [], []>} : vector<2x32xf32>, vector<32x96xf32>, vector<2x96xf32> -> vector<2x96xf32>
    %218 = arith.addf %217, %18 : vector<2x96xf32>
    %219 = vector.extract_strided_slice %216 {offsets = [0, 0], sizes = [2, 32], strides = [1, 1]} : vector<2x96xf32> to vector<2x32xf32>
    %220 = vector.extract_strided_slice %218 {offsets = [0, 0], sizes = [2, 32], strides = [1, 1]} : vector<2x96xf32> to vector<2x32xf32>
    %221 = arith.addf %219, %220 : vector<2x32xf32>
    %222 = arith.negf %221 : vector<2x32xf32>
    %223 = math.exp %222 : vector<2x32xf32>
    %cst_53 = arith.constant 1.000000e+00 : f32
    %224 = vector.broadcast %cst_53 : f32 to vector<2x32xf32>
    %225 = arith.addf %224, %223 : vector<2x32xf32>
    %226 = arith.divf %224, %225 : vector<2x32xf32>
    %227 = vector.extract_strided_slice %216 {offsets = [0, 32], sizes = [2, 32], strides = [1, 1]} : vector<2x96xf32> to vector<2x32xf32>
    %228 = vector.extract_strided_slice %218 {offsets = [0, 32], sizes = [2, 32], strides = [1, 1]} : vector<2x96xf32> to vector<2x32xf32>
    %229 = arith.addf %227, %228 : vector<2x32xf32>
    %230 = arith.negf %229 : vector<2x32xf32>
    %231 = math.exp %230 : vector<2x32xf32>
    %cst_54 = arith.constant 1.000000e+00 : f32
    %232 = vector.broadcast %cst_54 : f32 to vector<2x32xf32>
    %233 = arith.addf %232, %231 : vector<2x32xf32>
    %234 = arith.divf %232, %233 : vector<2x32xf32>
    %235 = vector.extract_strided_slice %216 {offsets = [0, 64], sizes = [2, 32], strides = [1, 1]} : vector<2x96xf32> to vector<2x32xf32>
    %236 = vector.extract_strided_slice %218 {offsets = [0, 64], sizes = [2, 32], strides = [1, 1]} : vector<2x96xf32> to vector<2x32xf32>
    %237 = arith.mulf %226, %236 : vector<2x32xf32>
    %238 = arith.addf %235, %237 : vector<2x32xf32>
    %239 = math.tanh %238 : vector<2x32xf32>
    %cst_55 = arith.constant 1.000000e+00 : f32
    %240 = vector.broadcast %cst_55 : f32 to vector<2x32xf32>
    %241 = arith.subf %240, %234 : vector<2x32xf32>
    %242 = arith.mulf %241, %239 : vector<2x32xf32>
    %243 = arith.mulf %234, %185 : vector<2x32xf32>
    %244 = arith.addf %242, %243 : vector<2x32xf32>
    %245 = vector.extract_strided_slice %6 {offsets = [8, 0], sizes = [2, 96], strides = [1, 1]} : vector<16x96xf32> to vector<2x96xf32>
    %cst_56 = arith.constant dense<0.000000e+00> : vector<2x96xf32>
    %246 = tpu.matmul %214, %8, %cst_56 {dimension_numbers = #tpu.dot_dimension_numbers<[1], [0], [0], [1], [0, 0, 1, 1], [], []>} : vector<2x32xf32>, vector<32x96xf32>, vector<2x96xf32> -> vector<2x96xf32>
    %247 = arith.addf %246, %14 : vector<2x96xf32>
    %248 = vector.extract_strided_slice %245 {offsets = [0, 0], sizes = [2, 32], strides = [1, 1]} : vector<2x96xf32> to vector<2x32xf32>
    %249 = vector.extract_strided_slice %247 {offsets = [0, 0], sizes = [2, 32], strides = [1, 1]} : vector<2x96xf32> to vector<2x32xf32>
    %250 = arith.addf %248, %249 : vector<2x32xf32>
    %251 = arith.negf %250 : vector<2x32xf32>
    %252 = math.exp %251 : vector<2x32xf32>
    %cst_57 = arith.constant 1.000000e+00 : f32
    %253 = vector.broadcast %cst_57 : f32 to vector<2x32xf32>
    %254 = arith.addf %253, %252 : vector<2x32xf32>
    %255 = arith.divf %253, %254 : vector<2x32xf32>
    %256 = vector.extract_strided_slice %245 {offsets = [0, 32], sizes = [2, 32], strides = [1, 1]} : vector<2x96xf32> to vector<2x32xf32>
    %257 = vector.extract_strided_slice %247 {offsets = [0, 32], sizes = [2, 32], strides = [1, 1]} : vector<2x96xf32> to vector<2x32xf32>
    %258 = arith.addf %256, %257 : vector<2x32xf32>
    %259 = arith.negf %258 : vector<2x32xf32>
    %260 = math.exp %259 : vector<2x32xf32>
    %cst_58 = arith.constant 1.000000e+00 : f32
    %261 = vector.broadcast %cst_58 : f32 to vector<2x32xf32>
    %262 = arith.addf %261, %260 : vector<2x32xf32>
    %263 = arith.divf %261, %262 : vector<2x32xf32>
    %264 = vector.extract_strided_slice %245 {offsets = [0, 64], sizes = [2, 32], strides = [1, 1]} : vector<2x96xf32> to vector<2x32xf32>
    %265 = vector.extract_strided_slice %247 {offsets = [0, 64], sizes = [2, 32], strides = [1, 1]} : vector<2x96xf32> to vector<2x32xf32>
    %266 = arith.mulf %255, %265 : vector<2x32xf32>
    %267 = arith.addf %264, %266 : vector<2x32xf32>
    %268 = math.tanh %267 : vector<2x32xf32>
    %cst_59 = arith.constant 1.000000e+00 : f32
    %269 = vector.broadcast %cst_59 : f32 to vector<2x32xf32>
    %270 = arith.subf %269, %263 : vector<2x32xf32>
    %271 = arith.mulf %270, %268 : vector<2x32xf32>
    %272 = arith.mulf %263, %214 : vector<2x32xf32>
    %273 = arith.addf %271, %272 : vector<2x32xf32>
    %cst_60 = arith.constant dense<0.000000e+00> : vector<2x96xf32>
    %274 = tpu.matmul %273, %22, %cst_60 {dimension_numbers = #tpu.dot_dimension_numbers<[1], [0], [0], [1], [0, 0, 1, 1], [], []>} : vector<2x32xf32>, vector<32x96xf32>, vector<2x96xf32> -> vector<2x96xf32>
    %275 = arith.addf %274, %26 : vector<2x96xf32>
    %cst_61 = arith.constant dense<0.000000e+00> : vector<2x96xf32>
    %276 = tpu.matmul %244, %10, %cst_61 {dimension_numbers = #tpu.dot_dimension_numbers<[1], [0], [0], [1], [0, 0, 1, 1], [], []>} : vector<2x32xf32>, vector<32x96xf32>, vector<2x96xf32> -> vector<2x96xf32>
    %277 = arith.addf %276, %18 : vector<2x96xf32>
    %278 = vector.extract_strided_slice %275 {offsets = [0, 0], sizes = [2, 32], strides = [1, 1]} : vector<2x96xf32> to vector<2x32xf32>
    %279 = vector.extract_strided_slice %277 {offsets = [0, 0], sizes = [2, 32], strides = [1, 1]} : vector<2x96xf32> to vector<2x32xf32>
    %280 = arith.addf %278, %279 : vector<2x32xf32>
    %281 = arith.negf %280 : vector<2x32xf32>
    %282 = math.exp %281 : vector<2x32xf32>
    %cst_62 = arith.constant 1.000000e+00 : f32
    %283 = vector.broadcast %cst_62 : f32 to vector<2x32xf32>
    %284 = arith.addf %283, %282 : vector<2x32xf32>
    %285 = arith.divf %283, %284 : vector<2x32xf32>
    %286 = vector.extract_strided_slice %275 {offsets = [0, 32], sizes = [2, 32], strides = [1, 1]} : vector<2x96xf32> to vector<2x32xf32>
    %287 = vector.extract_strided_slice %277 {offsets = [0, 32], sizes = [2, 32], strides = [1, 1]} : vector<2x96xf32> to vector<2x32xf32>
    %288 = arith.addf %286, %287 : vector<2x32xf32>
    %289 = arith.negf %288 : vector<2x32xf32>
    %290 = math.exp %289 : vector<2x32xf32>
    %cst_63 = arith.constant 1.000000e+00 : f32
    %291 = vector.broadcast %cst_63 : f32 to vector<2x32xf32>
    %292 = arith.addf %291, %290 : vector<2x32xf32>
    %293 = arith.divf %291, %292 : vector<2x32xf32>
    %294 = vector.extract_strided_slice %275 {offsets = [0, 64], sizes = [2, 32], strides = [1, 1]} : vector<2x96xf32> to vector<2x32xf32>
    %295 = vector.extract_strided_slice %277 {offsets = [0, 64], sizes = [2, 32], strides = [1, 1]} : vector<2x96xf32> to vector<2x32xf32>
    %296 = arith.mulf %285, %295 : vector<2x32xf32>
    %297 = arith.addf %294, %296 : vector<2x32xf32>
    %298 = math.tanh %297 : vector<2x32xf32>
    %cst_64 = arith.constant 1.000000e+00 : f32
    %299 = vector.broadcast %cst_64 : f32 to vector<2x32xf32>
    %300 = arith.subf %299, %293 : vector<2x32xf32>
    %301 = arith.mulf %300, %298 : vector<2x32xf32>
    %302 = arith.mulf %293, %244 : vector<2x32xf32>
    %303 = arith.addf %301, %302 : vector<2x32xf32>
    %304 = vector.extract_strided_slice %6 {offsets = [10, 0], sizes = [2, 96], strides = [1, 1]} : vector<16x96xf32> to vector<2x96xf32>
    %cst_65 = arith.constant dense<0.000000e+00> : vector<2x96xf32>
    %305 = tpu.matmul %273, %8, %cst_65 {dimension_numbers = #tpu.dot_dimension_numbers<[1], [0], [0], [1], [0, 0, 1, 1], [], []>} : vector<2x32xf32>, vector<32x96xf32>, vector<2x96xf32> -> vector<2x96xf32>
    %306 = arith.addf %305, %14 : vector<2x96xf32>
    %307 = vector.extract_strided_slice %304 {offsets = [0, 0], sizes = [2, 32], strides = [1, 1]} : vector<2x96xf32> to vector<2x32xf32>
    %308 = vector.extract_strided_slice %306 {offsets = [0, 0], sizes = [2, 32], strides = [1, 1]} : vector<2x96xf32> to vector<2x32xf32>
    %309 = arith.addf %307, %308 : vector<2x32xf32>
    %310 = arith.negf %309 : vector<2x32xf32>
    %311 = math.exp %310 : vector<2x32xf32>
    %cst_66 = arith.constant 1.000000e+00 : f32
    %312 = vector.broadcast %cst_66 : f32 to vector<2x32xf32>
    %313 = arith.addf %312, %311 : vector<2x32xf32>
    %314 = arith.divf %312, %313 : vector<2x32xf32>
    %315 = vector.extract_strided_slice %304 {offsets = [0, 32], sizes = [2, 32], strides = [1, 1]} : vector<2x96xf32> to vector<2x32xf32>
    %316 = vector.extract_strided_slice %306 {offsets = [0, 32], sizes = [2, 32], strides = [1, 1]} : vector<2x96xf32> to vector<2x32xf32>
    %317 = arith.addf %315, %316 : vector<2x32xf32>
    %318 = arith.negf %317 : vector<2x32xf32>
    %319 = math.exp %318 : vector<2x32xf32>
    %cst_67 = arith.constant 1.000000e+00 : f32
    %320 = vector.broadcast %cst_67 : f32 to vector<2x32xf32>
    %321 = arith.addf %320, %319 : vector<2x32xf32>
    %322 = arith.divf %320, %321 : vector<2x32xf32>
    %323 = vector.extract_strided_slice %304 {offsets = [0, 64], sizes = [2, 32], strides = [1, 1]} : vector<2x96xf32> to vector<2x32xf32>
    %324 = vector.extract_strided_slice %306 {offsets = [0, 64], sizes = [2, 32], strides = [1, 1]} : vector<2x96xf32> to vector<2x32xf32>
    %325 = arith.mulf %314, %324 : vector<2x32xf32>
    %326 = arith.addf %323, %325 : vector<2x32xf32>
    %327 = math.tanh %326 : vector<2x32xf32>
    %cst_68 = arith.constant 1.000000e+00 : f32
    %328 = vector.broadcast %cst_68 : f32 to vector<2x32xf32>
    %329 = arith.subf %328, %322 : vector<2x32xf32>
    %330 = arith.mulf %329, %327 : vector<2x32xf32>
    %331 = arith.mulf %322, %273 : vector<2x32xf32>
    %332 = arith.addf %330, %331 : vector<2x32xf32>
    %cst_69 = arith.constant dense<0.000000e+00> : vector<2x96xf32>
    %333 = tpu.matmul %332, %22, %cst_69 {dimension_numbers = #tpu.dot_dimension_numbers<[1], [0], [0], [1], [0, 0, 1, 1], [], []>} : vector<2x32xf32>, vector<32x96xf32>, vector<2x96xf32> -> vector<2x96xf32>
    %334 = arith.addf %333, %26 : vector<2x96xf32>
    %cst_70 = arith.constant dense<0.000000e+00> : vector<2x96xf32>
    %335 = tpu.matmul %303, %10, %cst_70 {dimension_numbers = #tpu.dot_dimension_numbers<[1], [0], [0], [1], [0, 0, 1, 1], [], []>} : vector<2x32xf32>, vector<32x96xf32>, vector<2x96xf32> -> vector<2x96xf32>
    %336 = arith.addf %335, %18 : vector<2x96xf32>
    %337 = vector.extract_strided_slice %334 {offsets = [0, 0], sizes = [2, 32], strides = [1, 1]} : vector<2x96xf32> to vector<2x32xf32>
    %338 = vector.extract_strided_slice %336 {offsets = [0, 0], sizes = [2, 32], strides = [1, 1]} : vector<2x96xf32> to vector<2x32xf32>
    %339 = arith.addf %337, %338 : vector<2x32xf32>
    %340 = arith.negf %339 : vector<2x32xf32>
    %341 = math.exp %340 : vector<2x32xf32>
    %cst_71 = arith.constant 1.000000e+00 : f32
    %342 = vector.broadcast %cst_71 : f32 to vector<2x32xf32>
    %343 = arith.addf %342, %341 : vector<2x32xf32>
    %344 = arith.divf %342, %343 : vector<2x32xf32>
    %345 = vector.extract_strided_slice %334 {offsets = [0, 32], sizes = [2, 32], strides = [1, 1]} : vector<2x96xf32> to vector<2x32xf32>
    %346 = vector.extract_strided_slice %336 {offsets = [0, 32], sizes = [2, 32], strides = [1, 1]} : vector<2x96xf32> to vector<2x32xf32>
    %347 = arith.addf %345, %346 : vector<2x32xf32>
    %348 = arith.negf %347 : vector<2x32xf32>
    %349 = math.exp %348 : vector<2x32xf32>
    %cst_72 = arith.constant 1.000000e+00 : f32
    %350 = vector.broadcast %cst_72 : f32 to vector<2x32xf32>
    %351 = arith.addf %350, %349 : vector<2x32xf32>
    %352 = arith.divf %350, %351 : vector<2x32xf32>
    %353 = vector.extract_strided_slice %334 {offsets = [0, 64], sizes = [2, 32], strides = [1, 1]} : vector<2x96xf32> to vector<2x32xf32>
    %354 = vector.extract_strided_slice %336 {offsets = [0, 64], sizes = [2, 32], strides = [1, 1]} : vector<2x96xf32> to vector<2x32xf32>
    %355 = arith.mulf %344, %354 : vector<2x32xf32>
    %356 = arith.addf %353, %355 : vector<2x32xf32>
    %357 = math.tanh %356 : vector<2x32xf32>
    %cst_73 = arith.constant 1.000000e+00 : f32
    %358 = vector.broadcast %cst_73 : f32 to vector<2x32xf32>
    %359 = arith.subf %358, %352 : vector<2x32xf32>
    %360 = arith.mulf %359, %357 : vector<2x32xf32>
    %361 = arith.mulf %352, %303 : vector<2x32xf32>
    %362 = arith.addf %360, %361 : vector<2x32xf32>
    %363 = vector.extract_strided_slice %6 {offsets = [12, 0], sizes = [2, 96], strides = [1, 1]} : vector<16x96xf32> to vector<2x96xf32>
    %cst_74 = arith.constant dense<0.000000e+00> : vector<2x96xf32>
    %364 = tpu.matmul %332, %8, %cst_74 {dimension_numbers = #tpu.dot_dimension_numbers<[1], [0], [0], [1], [0, 0, 1, 1], [], []>} : vector<2x32xf32>, vector<32x96xf32>, vector<2x96xf32> -> vector<2x96xf32>
    %365 = arith.addf %364, %14 : vector<2x96xf32>
    %366 = vector.extract_strided_slice %363 {offsets = [0, 0], sizes = [2, 32], strides = [1, 1]} : vector<2x96xf32> to vector<2x32xf32>
    %367 = vector.extract_strided_slice %365 {offsets = [0, 0], sizes = [2, 32], strides = [1, 1]} : vector<2x96xf32> to vector<2x32xf32>
    %368 = arith.addf %366, %367 : vector<2x32xf32>
    %369 = arith.negf %368 : vector<2x32xf32>
    %370 = math.exp %369 : vector<2x32xf32>
    %cst_75 = arith.constant 1.000000e+00 : f32
    %371 = vector.broadcast %cst_75 : f32 to vector<2x32xf32>
    %372 = arith.addf %371, %370 : vector<2x32xf32>
    %373 = arith.divf %371, %372 : vector<2x32xf32>
    %374 = vector.extract_strided_slice %363 {offsets = [0, 32], sizes = [2, 32], strides = [1, 1]} : vector<2x96xf32> to vector<2x32xf32>
    %375 = vector.extract_strided_slice %365 {offsets = [0, 32], sizes = [2, 32], strides = [1, 1]} : vector<2x96xf32> to vector<2x32xf32>
    %376 = arith.addf %374, %375 : vector<2x32xf32>
    %377 = arith.negf %376 : vector<2x32xf32>
    %378 = math.exp %377 : vector<2x32xf32>
    %cst_76 = arith.constant 1.000000e+00 : f32
    %379 = vector.broadcast %cst_76 : f32 to vector<2x32xf32>
    %380 = arith.addf %379, %378 : vector<2x32xf32>
    %381 = arith.divf %379, %380 : vector<2x32xf32>
    %382 = vector.extract_strided_slice %363 {offsets = [0, 64], sizes = [2, 32], strides = [1, 1]} : vector<2x96xf32> to vector<2x32xf32>
    %383 = vector.extract_strided_slice %365 {offsets = [0, 64], sizes = [2, 32], strides = [1, 1]} : vector<2x96xf32> to vector<2x32xf32>
    %384 = arith.mulf %373, %383 : vector<2x32xf32>
    %385 = arith.addf %382, %384 : vector<2x32xf32>
    %386 = math.tanh %385 : vector<2x32xf32>
    %cst_77 = arith.constant 1.000000e+00 : f32
    %387 = vector.broadcast %cst_77 : f32 to vector<2x32xf32>
    %388 = arith.subf %387, %381 : vector<2x32xf32>
    %389 = arith.mulf %388, %386 : vector<2x32xf32>
    %390 = arith.mulf %381, %332 : vector<2x32xf32>
    %391 = arith.addf %389, %390 : vector<2x32xf32>
    %cst_78 = arith.constant dense<0.000000e+00> : vector<2x96xf32>
    %392 = tpu.matmul %391, %22, %cst_78 {dimension_numbers = #tpu.dot_dimension_numbers<[1], [0], [0], [1], [0, 0, 1, 1], [], []>} : vector<2x32xf32>, vector<32x96xf32>, vector<2x96xf32> -> vector<2x96xf32>
    %393 = arith.addf %392, %26 : vector<2x96xf32>
    %cst_79 = arith.constant dense<0.000000e+00> : vector<2x96xf32>
    %394 = tpu.matmul %362, %10, %cst_79 {dimension_numbers = #tpu.dot_dimension_numbers<[1], [0], [0], [1], [0, 0, 1, 1], [], []>} : vector<2x32xf32>, vector<32x96xf32>, vector<2x96xf32> -> vector<2x96xf32>
    %395 = arith.addf %394, %18 : vector<2x96xf32>
    %396 = vector.extract_strided_slice %393 {offsets = [0, 0], sizes = [2, 32], strides = [1, 1]} : vector<2x96xf32> to vector<2x32xf32>
    %397 = vector.extract_strided_slice %395 {offsets = [0, 0], sizes = [2, 32], strides = [1, 1]} : vector<2x96xf32> to vector<2x32xf32>
    %398 = arith.addf %396, %397 : vector<2x32xf32>
    %399 = arith.negf %398 : vector<2x32xf32>
    %400 = math.exp %399 : vector<2x32xf32>
    %cst_80 = arith.constant 1.000000e+00 : f32
    %401 = vector.broadcast %cst_80 : f32 to vector<2x32xf32>
    %402 = arith.addf %401, %400 : vector<2x32xf32>
    %403 = arith.divf %401, %402 : vector<2x32xf32>
    %404 = vector.extract_strided_slice %393 {offsets = [0, 32], sizes = [2, 32], strides = [1, 1]} : vector<2x96xf32> to vector<2x32xf32>
    %405 = vector.extract_strided_slice %395 {offsets = [0, 32], sizes = [2, 32], strides = [1, 1]} : vector<2x96xf32> to vector<2x32xf32>
    %406 = arith.addf %404, %405 : vector<2x32xf32>
    %407 = arith.negf %406 : vector<2x32xf32>
    %408 = math.exp %407 : vector<2x32xf32>
    %cst_81 = arith.constant 1.000000e+00 : f32
    %409 = vector.broadcast %cst_81 : f32 to vector<2x32xf32>
    %410 = arith.addf %409, %408 : vector<2x32xf32>
    %411 = arith.divf %409, %410 : vector<2x32xf32>
    %412 = vector.extract_strided_slice %393 {offsets = [0, 64], sizes = [2, 32], strides = [1, 1]} : vector<2x96xf32> to vector<2x32xf32>
    %413 = vector.extract_strided_slice %395 {offsets = [0, 64], sizes = [2, 32], strides = [1, 1]} : vector<2x96xf32> to vector<2x32xf32>
    %414 = arith.mulf %403, %413 : vector<2x32xf32>
    %415 = arith.addf %412, %414 : vector<2x32xf32>
    %416 = math.tanh %415 : vector<2x32xf32>
    %cst_82 = arith.constant 1.000000e+00 : f32
    %417 = vector.broadcast %cst_82 : f32 to vector<2x32xf32>
    %418 = arith.subf %417, %411 : vector<2x32xf32>
    %419 = arith.mulf %418, %416 : vector<2x32xf32>
    %420 = arith.mulf %411, %362 : vector<2x32xf32>
    %421 = arith.addf %419, %420 : vector<2x32xf32>
    %422 = vector.extract_strided_slice %6 {offsets = [14, 0], sizes = [2, 96], strides = [1, 1]} : vector<16x96xf32> to vector<2x96xf32>
    %cst_83 = arith.constant dense<0.000000e+00> : vector<2x96xf32>
    %423 = tpu.matmul %391, %8, %cst_83 {dimension_numbers = #tpu.dot_dimension_numbers<[1], [0], [0], [1], [0, 0, 1, 1], [], []>} : vector<2x32xf32>, vector<32x96xf32>, vector<2x96xf32> -> vector<2x96xf32>
    %424 = arith.addf %423, %14 : vector<2x96xf32>
    %425 = vector.extract_strided_slice %422 {offsets = [0, 0], sizes = [2, 32], strides = [1, 1]} : vector<2x96xf32> to vector<2x32xf32>
    %426 = vector.extract_strided_slice %424 {offsets = [0, 0], sizes = [2, 32], strides = [1, 1]} : vector<2x96xf32> to vector<2x32xf32>
    %427 = arith.addf %425, %426 : vector<2x32xf32>
    %428 = arith.negf %427 : vector<2x32xf32>
    %429 = math.exp %428 : vector<2x32xf32>
    %cst_84 = arith.constant 1.000000e+00 : f32
    %430 = vector.broadcast %cst_84 : f32 to vector<2x32xf32>
    %431 = arith.addf %430, %429 : vector<2x32xf32>
    %432 = arith.divf %430, %431 : vector<2x32xf32>
    %433 = vector.extract_strided_slice %422 {offsets = [0, 32], sizes = [2, 32], strides = [1, 1]} : vector<2x96xf32> to vector<2x32xf32>
    %434 = vector.extract_strided_slice %424 {offsets = [0, 32], sizes = [2, 32], strides = [1, 1]} : vector<2x96xf32> to vector<2x32xf32>
    %435 = arith.addf %433, %434 : vector<2x32xf32>
    %436 = arith.negf %435 : vector<2x32xf32>
    %437 = math.exp %436 : vector<2x32xf32>
    %cst_85 = arith.constant 1.000000e+00 : f32
    %438 = vector.broadcast %cst_85 : f32 to vector<2x32xf32>
    %439 = arith.addf %438, %437 : vector<2x32xf32>
    %440 = arith.divf %438, %439 : vector<2x32xf32>
    %441 = vector.extract_strided_slice %422 {offsets = [0, 64], sizes = [2, 32], strides = [1, 1]} : vector<2x96xf32> to vector<2x32xf32>
    %442 = vector.extract_strided_slice %424 {offsets = [0, 64], sizes = [2, 32], strides = [1, 1]} : vector<2x96xf32> to vector<2x32xf32>
    %443 = arith.mulf %432, %442 : vector<2x32xf32>
    %444 = arith.addf %441, %443 : vector<2x32xf32>
    %445 = math.tanh %444 : vector<2x32xf32>
    %cst_86 = arith.constant 1.000000e+00 : f32
    %446 = vector.broadcast %cst_86 : f32 to vector<2x32xf32>
    %447 = arith.subf %446, %440 : vector<2x32xf32>
    %448 = arith.mulf %447, %445 : vector<2x32xf32>
    %449 = arith.mulf %440, %391 : vector<2x32xf32>
    %450 = arith.addf %448, %449 : vector<2x32xf32>
    %cst_87 = arith.constant dense<0.000000e+00> : vector<2x96xf32>
    %451 = tpu.matmul %450, %22, %cst_87 {dimension_numbers = #tpu.dot_dimension_numbers<[1], [0], [0], [1], [0, 0, 1, 1], [], []>} : vector<2x32xf32>, vector<32x96xf32>, vector<2x96xf32> -> vector<2x96xf32>
    %452 = arith.addf %451, %26 : vector<2x96xf32>
    %cst_88 = arith.constant dense<0.000000e+00> : vector<2x96xf32>
    %453 = tpu.matmul %421, %10, %cst_88 {dimension_numbers = #tpu.dot_dimension_numbers<[1], [0], [0], [1], [0, 0, 1, 1], [], []>} : vector<2x32xf32>, vector<32x96xf32>, vector<2x96xf32> -> vector<2x96xf32>
    %454 = arith.addf %453, %18 : vector<2x96xf32>
    %455 = vector.extract_strided_slice %452 {offsets = [0, 0], sizes = [2, 32], strides = [1, 1]} : vector<2x96xf32> to vector<2x32xf32>
    %456 = vector.extract_strided_slice %454 {offsets = [0, 0], sizes = [2, 32], strides = [1, 1]} : vector<2x96xf32> to vector<2x32xf32>
    %457 = arith.addf %455, %456 : vector<2x32xf32>
    %458 = arith.negf %457 : vector<2x32xf32>
    %459 = math.exp %458 : vector<2x32xf32>
    %cst_89 = arith.constant 1.000000e+00 : f32
    %460 = vector.broadcast %cst_89 : f32 to vector<2x32xf32>
    %461 = arith.addf %460, %459 : vector<2x32xf32>
    %462 = arith.divf %460, %461 : vector<2x32xf32>
    %463 = vector.extract_strided_slice %452 {offsets = [0, 32], sizes = [2, 32], strides = [1, 1]} : vector<2x96xf32> to vector<2x32xf32>
    %464 = vector.extract_strided_slice %454 {offsets = [0, 32], sizes = [2, 32], strides = [1, 1]} : vector<2x96xf32> to vector<2x32xf32>
    %465 = arith.addf %463, %464 : vector<2x32xf32>
    %466 = arith.negf %465 : vector<2x32xf32>
    %467 = math.exp %466 : vector<2x32xf32>
    %cst_90 = arith.constant 1.000000e+00 : f32
    %468 = vector.broadcast %cst_90 : f32 to vector<2x32xf32>
    %469 = arith.addf %468, %467 : vector<2x32xf32>
    %470 = arith.divf %468, %469 : vector<2x32xf32>
    %471 = vector.extract_strided_slice %452 {offsets = [0, 64], sizes = [2, 32], strides = [1, 1]} : vector<2x96xf32> to vector<2x32xf32>
    %472 = vector.extract_strided_slice %454 {offsets = [0, 64], sizes = [2, 32], strides = [1, 1]} : vector<2x96xf32> to vector<2x32xf32>
    %473 = arith.mulf %462, %472 : vector<2x32xf32>
    %474 = arith.addf %471, %473 : vector<2x32xf32>
    %475 = math.tanh %474 : vector<2x32xf32>
    %cst_91 = arith.constant 1.000000e+00 : f32
    %476 = vector.broadcast %cst_91 : f32 to vector<2x32xf32>
    %477 = arith.subf %476, %470 : vector<2x32xf32>
    %478 = arith.mulf %477, %475 : vector<2x32xf32>
    %479 = arith.mulf %470, %421 : vector<2x32xf32>
    %480 = arith.addf %478, %479 : vector<2x32xf32>
    %c0_92 = arith.constant 0 : index
    %c0_93 = arith.constant 0 : index
    %481 = vector.load %arg7[%c0_92, %c0_93] : memref<32x10xf32, #tpu.memory_space<vmem>>, vector<32x10xf32>
    %cst_94 = arith.constant dense<0.000000e+00> : vector<2x10xf32>
    %482 = tpu.matmul %480, %481, %cst_94 {dimension_numbers = #tpu.dot_dimension_numbers<[1], [0], [0], [1], [0, 0, 1, 1], [], []>} : vector<2x32xf32>, vector<32x10xf32>, vector<2x10xf32> -> vector<2x10xf32>
    %c0_95 = arith.constant 0 : index
    %c0_96 = arith.constant 0 : index
    %483 = vector.load %arg8[%c0_95, %c0_96] : memref<1x10xf32, #tpu.memory_space<vmem>>, vector<1x10xf32>
    %484 = vector.broadcast %483 : vector<1x10xf32> to vector<2x10xf32>
    %485 = arith.addf %482, %484 : vector<2x10xf32>
    %c0_97 = arith.constant 0 : index
    %c0_98 = arith.constant 0 : index
    %486 = vector.load %arg9[%c0_97, %c0_98] : memref<2x10xf32, #tpu.memory_space<vmem>>, vector<2x10xf32>
    tpu.vector_store %arg9[%c0_97, %c0_98], %485 {strides = array<i32>} : memref<2x10xf32, #tpu.memory_space<vmem>>, vector<2x10xf32>,
    return
  }
}

</mosaic_0001>

<bundles_post_ra>
// kernel: rnn_forward.1
= control target key start
LH: loop header
LB: loop body
LE: loop exit
PB: predicated region body
PF: predicated region fallthrough
CT: control target
= control target key end

     0   :  { %14 = vsyncpa [#allocation3], 0  ;;  %s3657_s0 = inlined_call_operand.vmem [shape: f32[16,16], index: 0, kind: input, shape index: {}]   ;;  %s3658_s1 = inlined_call_operand.hbm [shape: f32[16,96], index: 1, kind: input, shape index: {}]   ;;  %s3659_s2 = inlined_call_operand.hbm [shape: f32[1,96], index: 2, kind: input, shape index: {}]   ;;  %s3660_s3 = inlined_call_operand.vmem [shape: f32[1,32,96], index: 3, kind: input, shape index: {}]   ;;  %s3661_s4 = inlined_call_operand.hbm [shape: f32[1,1,96], index: 4, kind: input, shape index: {}]   ;;  %s3662_s5 = inlined_call_operand.vmem [shape: f32[2,32,96], index: 5, kind: input, shape index: {}]   ;;  %s3663_s6 = inlined_call_operand.hbm [shape: f32[2,1,96], index: 6, kind: input, shape index: {}]   ;;  %s3664_s7 = inlined_call_operand.vmem [shape: f32[32,10], index: 7, kind: input, shape index: {}]   ;;  %s3665_s8 = inlined_call_operand.hbm [shape: f32[1,10], index: 8, kind: input, shape index: {}]   ;;  %s3666_s9 = inlined_call_operand.hbm [shape: f32[2,10], index: 9, kind: output, shape index: {}]  }
   0x1   :  { %15 = vsyncpa [#allocation6], 0 }
   0x2   :  { %16 = vsyncpa [#allocation9], 0 }
   0x3   :  { %17 = vsyncpa [#allocation4], 0  ;;  %s3061_s30 = smov [#allocation5]   ;;  %s3062_s11 = smov [#allocation8]  }
   0x4   :  { %s38_s10 = sshll.u32 %s3061_s30, 4  ;;  %s61_s12 = sshll.u32 %s3062_s11, 4  ;;  %s39_s10 = int_to_ptr.vmem [resolvable:$true] %s38_s10  ;;  %s62_s12 = int_to_ptr.vmem [resolvable:$true] %s61_s12 }
   0x5   :  { %s2941_s13 = scalar_lea.vmem %s39_s10, 16  ;;  %s2945_s14 = scalar_lea.vmem %s39_s10, 32 }
   0x6   :  { %p2942_p0 = scmp.ne.s32.totalorder %s39_s10, %s2941_s13  ;;  %p2946_p1 = scmp.lt.s32.totalorder %s39_s10, %s39_s10 }
   0x7   :  { %p2947_p2 = scmp.lt.s32.totalorder %s2945_s14, %s2941_s13 }
   0x9   :  { %p2948_p3 = por %p2947_p2, %p2946_p1 }
   0xb   :  { %p2949_p4 = pnand %p2948_p3, %p2942_p0 }
   0xd   :  { %2952 = shalt.err (!%p2949_p4)
}
   0xe   :  { %41 = dma.hbm_to_vmem [thread:$0]  %s3659_s2, 16, %s39_s10, [#allocation6]  }
   0xf   :  { %s2961_s17 = scalar_lea.vmem %s62_s12, 32  ;;  %p2966_p6 = scmp.lt.s32.totalorder %s62_s12, %s62_s12 }
  0x10   :  { %p2962_p5 = scmp.ne.s32.totalorder %s62_s12, %s2961_s17  ;;  %p2967_p7 = scmp.lt.s32.totalorder %s2961_s17, %s2961_s17 }
  0x12   :  { %p2968_p8 = por %p2967_p7, %p2966_p6 }
  0x14   :  { %p2969_p9 = pnand %p2968_p8, %p2962_p5 }
  0x16   :  { %2972 = shalt.err (!%p2969_p9)
}
  0x17   :  { %s3063_s18 = smov 16   ;;  %s3064_s19 = smov 1  }
  0x18   :  { %67 = dma.hbm_to_vmem [thread:$0]  %s3663_s6, 32, %s62_s12, [#allocation9], %s3063_s18, %s3063_s18, %s3064_s19  }
  0x19   :  { %s3065_s22 = smov [#allocation2]  }
  0x1a   :  { %s25_s23 = sshll.u32 %s3065_s22, 4  ;;  %s26_s23 = int_to_ptr.vmem [resolvable:$true] %s25_s23 }
  0x1b   :  { %s2981_s24 = scalar_lea.vmem %s26_s23, 256  ;;  %p2986_p11 = scmp.lt.s32.totalorder %s26_s23, %s26_s23 }
  0x1c   :  { %p2982_p10 = scmp.ne.s32.totalorder %s26_s23, %s2981_s24  ;;  %p2987_p12 = scmp.lt.s32.totalorder %s2981_s24, %s2981_s24 }
  0x1e   :  { %p2988_p13 = por %p2987_p12, %p2986_p11 }
  0x20   :  { %p2989_p0 = pnand %p2988_p13, %p2982_p10 }
  0x22   :  { %2992 = shalt.err (!%p2989_p0)
}
  0x23   :  { %s3066_s2 = smov 128   ;;  %s3067_s25 = smov 8  }
  0x24   :  { %31 = dma.hbm_to_vmem [thread:$0]  %s3658_s1, 256, %s26_s23, [#allocation3], %s3066_s2, %s3066_s2, %s3067_s25  }
  0x25   :  { %s3068_s28 = smov [#allocation7]   ;;  %s3069_s6 = smov [#allocation10]  }
  0x26   :  { %s50_s29 = sshll.u32 %s3068_s28, 4  ;;  %s76_s30 = sshll.u32 %s3069_s6, 4  ;;  %s51_s29 = int_to_ptr.vmem [resolvable:$true] %s50_s29  ;;  %s77_s30 = int_to_ptr.vmem [resolvable:$true] %s76_s30 }
  0x27   :  { %s3001_s10 = scalar_lea.vmem %s51_s29, 16  ;;  %s3005_s11 = scalar_lea.vmem %s51_s29, 32 }
  0x28   :  { %p3002_p1 = scmp.ne.s32.totalorder %s51_s29, %s3001_s10  ;;  %p3006_p2 = scmp.lt.s32.totalorder %s51_s29, %s51_s29 }
  0x29   :  { %p3007_p3 = scmp.lt.s32.totalorder %s3005_s11, %s3001_s10 }
  0x2b   :  { %p3008_p4 = por %p3007_p3, %p3006_p2 }
  0x2d   :  { %p3009_p5 = pnand %p3008_p4, %p3002_p1 }
  0x2f   :  { %3012 = shalt.err (!%p3009_p5)
}
  0x30   :  { %53 = dma.hbm_to_vmem [thread:$0]  %s3661_s4, 16, %s51_s29, [#allocation6]  }
  0x31   :  { %s3021_s14 = scalar_lea.vmem %s77_s30, 16  ;;  %s3025_s1 = scalar_lea.vmem %s77_s30, 32 }
  0x32   :  { %p3022_p6 = scmp.ne.s32.totalorder %s77_s30, %s3021_s14  ;;  %p3026_p7 = scmp.lt.s32.totalorder %s77_s30, %s77_s30 }
  0x33   :  { %p3027_p8 = scmp.lt.s32.totalorder %s3025_s1, %s3021_s14 }
  0x35   :  { %p3028_p9 = por %p3027_p8, %p3026_p7 }
  0x37   :  { %p3029_p10 = pnand %p3028_p9, %p3022_p6 }
  0x39   :  { %3032 = shalt.err (!%p3029_p10)
}
  0x3a   :  { %79 = dma.hbm_to_vmem [thread:$0]  %s3665_s8, 16, %s77_s30, [#allocation9]  }
  0x3b   :  { %3053 = dma.done.wait [#allocation3], 256  }
  0x3c   :  { %3054 = vsyncadd [#allocation3], 4294967040 }
  0x3d   :  { %3055 = dma.done.wait [#allocation6], 32  }
  0x3e   :  { %3056 = vsyncadd [#allocation6], 4294967264 }
  0x3f   :  { %3057 = dma.done.wait [#allocation9], 48  }
  0x40   :  { %3058 = vsyncadd [#allocation9], 4294967248  ;;  %vm106_vm0 = vcmask 130048   ;;  %v98_v0 = vld [vmem:[#allocation2 + $0x8] sm:$0xff]  ;;  %v97_v1 = vld [vmem:[#allocation2] sm:$0xff]  ;;  %s3070_s19 = smov 64  }
  0x41   :  { %v95_v2 = vld [vmem:[%s3657_s0] sm:$0xff]  ;;  %2552 = vmatprep.subr.mxu0 %v98_v0  ;;  %v3143_v3 = vld [vmem:[#allocation8] ss:$0 sm:$0xff]  ;;  %v96_v4 = vld [vmem:[%s3657_s0 + $0x8] sm:$0xff]  ;;  %v3071_v20 = vmov 0.0   ;;  %vm3072_vm1 = vmmov 0  }
  0x42   :  { %2556 = vmatprep.mubr.msk.f32.mxu0 %vm106_vm0, %v95_v2  ;;  %2553 = vmatpush3.msra.mxu0 %v98_v0  ;;  %v2383_v5 = vld [vmem:[#allocation5] ss:$0 sm:$0xff]  ;;  %v3160_v18 = vld [vmem:[%s3660_s3 + $0x18] sm:$0xff]  ;;  %v3186_v23 = vld [vmem:[%s3660_s3 + $0x8] sm:$0xff]  ;;  %s3073_s12 = smov 96   ;;  %vm248_vm2 = vcmask 261120  }
  0x43   :  { %229 = vrot.lane.b32.xlu0 %v3143_v3, %s3070_s19  ;;  %2554 = vmatprep.subr.mxu0 %v97_v1  ;;  %v3165_v19 = vld [vmem:[%s3662_s5 + $0x18] sm:$0xff]  ;;  %v3172_v21 = vld [vmem:[%s3660_s3 + $0x10] sm:$0xff]  ;;  %v3191_v24 = vld [vmem:[%s3662_s5 + $0x8] sm:$0xff]  ;;  %s3074_s16 = smov [#allocation11]   ;;  %vm2364_vm3 = vcmask 74752  }
  0x44   :  { %2555 = vmatpush3.msra.mxu0 %v97_v1  ;;  %2559 = vmatprep.subr.mxu1 %v3071_v20  ;;  %v3177_v22 = vld [vmem:[%s3662_s5 + $0x10] sm:$0xff]  ;;  %v3200_v25 = vld [vmem:[%s3660_s3] sm:$0xff]  ;;  %v3255_v59 = vld [vmem:[%s3662_s5 + $0x38] sm:$0xff] }
  0x45   :  { %2557 = vmatmul.mubr.msk.f32.vlgmr.msra.gmra.mxu0 %vm106_vm0, %v96_v4  ;;  %2570 = vmatprep.subr.mxu0 %v3071_v20  ;;  %v3207_v26 = vld [vmem:[%s3662_s5] sm:$0xff]  ;;  %v3224_v31 = vld [vmem:[#allocation8 + $0x1] ss:$0 sm:$0xff]  ;;  %v3242_v33 = vld [vmem:[#allocation7] ss:$0 sm:$0xff] }
  0x46   :  { %2560 = vmatpush3.msra.mxu1 %v3160_v18  ;;  %2571 = vmatpush3.msra.mxu0 %v3165_v19  ;;  %v3260_v60 = vld [vmem:[%s3662_s5 + $0x30] sm:$0xff]  ;;  %v3267_v61 = vld [vmem:[%s3662_s5 + $0x28] sm:$0xff]  ;;  %v3274_v62 = vld [vmem:[%s3662_s5 + $0x20] sm:$0xff] }
  0x47   :  { %2561 = vmatprep.subr.mxu1 %v3071_v20  ;;  %2572 = vmatprep.subr.mxu0 %v3071_v20 }
  0x48   :  { %2562 = vmatpush3.msra.mxu1 %v3172_v21  ;;  %2573 = vmatpush3.msra.mxu0 %v3177_v22 }
  0x49   :  { %2563 = vmatprep.subr.mxu1 %v3071_v20  ;;  %2574 = vmatprep.subr.mxu0 %v3071_v20 }
  0x4a   :  { %2564 = vmatpush3.msra.mxu1 %v3186_v23  ;;  %2575 = vmatpush3.msra.mxu0 %v3191_v24 }
  0x4b   :  { %2565 = vmatprep.subr.mxu1 %v3071_v20  ;;  %2576 = vmatprep.subr.mxu0 %v3071_v20 }
  0x4c   :  { %2566 = vmatpush3.msra.mxu1 %v3200_v25  ;;  %2567 = vmatprep.mubr.msk.f32.mxu1 %vm3072_vm1, %v3071_v20 }
  0x4d   :  { %2577 = vmatpush3.msra.mxu0 %v3207_v26  ;;  %2578 = vmatprep.mubr.msk.f32.mxu0 %vm3072_vm1, %v3071_v20 }
  0x4e   :  { %2592 = vmatprep.subr.mxu0 %v3071_v20  ;;  %2581 = vmatprep.subr.mxu1 %v3071_v20 }
  0xb5   :  { %v230_v13 = vpop.permute.xlu0 %229 }
 0x105   :  { %v2558_v6 = vpop.f32.mrf.mxu0 }
 0x106   :  { %v3150_v7 = vadd.f32 %v2558_v6, %v2383_v5 }
 0x107   :  { %v179_v8 = vpop.f32.mrf.mxu0 }
 0x108   :  { %v3152_v9 = vadd.f32 %v2383_v5, %v179_v8 }
 0x10a   :  { %v2393_v10 = vmul.f32 -1.442695, %v3152_v9 }
 0x10c   :  { %2826 = vpow2.f32 %v2393_v10 }
 0x119   :  { %v2827_v11 = vpop.eup %2826 }
 0x11a   :  { %v226_v12 = vadd.f32 1.0, %v2827_v11 }
 0x11c   :  { %2828 = vrcp.f32 %v226_v12 }
 0x129   :  { %v2829_v14 = vpop.eup %2828 }
 0x12a   :  { %v232_v15 = vmul.f32 %v2829_v14, %v230_v13  ;;  %v239_v28 = vsub.f32 1.0, %v2829_v14 }
 0x12c   :  { %234 = vrot.lane.b32.xlu0 %v232_v15, %s3070_s19 }
 0x19e   :  { %v235_v16 = vpop.permute.xlu0 %234 }
 0x19f   :  { %v237_v17 = vadd.f32 %v235_v16, %v3152_v9 }
 0x1a1   :  { %2830 = vtanh.f32 %v237_v17 }
 0x1ae   :  { %v2831_v27 = vpop.eup %2830 }
 0x1af   :  { %241 = vrot.lane.b32.xlu1 %v2831_v27, %s3073_s12 }
 0x221   :  { %v242_v29 = vpop.permute.xlu1 %241 }
 0x222   :  { %v3220_v30 = vmul.f32 %v242_v29, %v239_v28 }
 0x224   :  { %246 = vrot.lane.b32.xlu1 %v3220_v30, %s3073_s12  ;;  %v439_v4 = vrot.slane %v3220_v30, 6 }
 0x228   :  { %327 = vrot.lane.b32.xlu1 %v3224_v31, %s3070_s19 }
 0x296   :  { %v247_v32 = vpop.permute.xlu1 %246 }
 0x297   :  { %2568 = vmatmul.mubr.msk.f32.vlgmr.msra.gmra.mxu1 %vm248_vm2, %v247_v32  ;;  %2579 = vmatmul.mubr.msk.f32.vlgmr.msra.gmra.mxu0 %vm248_vm2, %v247_v32 }
 0x298   :  { %2600 = vmatprep.mubr.msk.f32.mxu0 %vm3072_vm1, %v3071_v20  ;;  %2582 = vmatpush3.msra.mxu1 %v3160_v18 }
 0x299   :  { %2583 = vmatprep.subr.mxu1 %v3071_v20  ;;  %2589 = vmatprep.mubr.msk.f32.mxu1 %vm3072_vm1, %v3071_v20 }
 0x29a   :  { %2584 = vmatpush3.msra.mxu1 %v3172_v21  ;;  %v328_v44 = vpop.permute.xlu1 %327  ;;  %2593 = vmatpush3.msra.mxu0 %v3255_v59 }
 0x29b   :  { %2585 = vmatprep.subr.mxu1 %v3071_v20  ;;  %2594 = vmatprep.subr.mxu0 %v3071_v20 }
 0x29c   :  { %2586 = vmatpush3.msra.mxu1 %v3186_v23  ;;  %2595 = vmatpush3.msra.mxu0 %v3260_v60 }
 0x29d   :  { %2587 = vmatprep.subr.mxu1 %v3071_v20  ;;  %2596 = vmatprep.subr.mxu0 %v3071_v20 }
 0x29e   :  { %2588 = vmatpush3.msra.mxu1 %v3200_v25  ;;  %2597 = vmatpush3.msra.mxu0 %v3267_v61 }
 0x29f   :  { %2603 = vmatprep.subr.mxu1 %v3071_v20  ;;  %2598 = vmatprep.subr.mxu0 %v3071_v20 }
 0x2a0   :  { %2599 = vmatpush3.msra.mxu0 %v3274_v62 }
 0x2a1   :  { %2614 = vmatprep.subr.mxu0 %v3071_v20 }
 0x357   :  { %v317_v34 = vpop.f32.mrf.mxu1  ;;  %v409_v35 = vpop.f32.mrf.mxu0 }
 0x358   :  { %v318_v36 = vadd.f32 %v3242_v33, %v317_v34  ;;  %v410_v37 = vadd.f32 %v3143_v3, %v409_v35 }
 0x359   :  { %v2569_v38 = vpop.f32.mrf.mxu1  ;;  %v2580_v39 = vpop.f32.mrf.mxu0 }
 0x35a   :  { %v2395_v40 = vmul.f32 -1.442695, %v318_v36  ;;  %v414_v41 = vrot.slane %v410_v37, 6 }
 0x35c   :  { %2832 = vpow2.f32 %v2395_v40  ;;  %423 = vrot.lane.b32.xlu0 %v414_v41, %s3070_s19  ;;  %v416_v47 = vadd.f32 %v414_v41, %v3152_v9 }
 0x35e   :  { %v2397_v48 = vmul.f32 -1.442695, %v416_v47 }
 0x369   :  { %v2833_v42 = vpop.eup %2832 }
 0x36a   :  { %v324_v43 = vadd.f32 1.0, %v2833_v42 }
 0x36c   :  { %2834 = vrcp.f32 %v324_v43 }
 0x36d   :  { %2836 = vpow2.f32 %v2397_v48 }
 0x379   :  { %v2835_v45 = vpop.eup %2834 }
 0x37a   :  { %v330_v46 = vmul.f32 %v2835_v45, %v328_v44  ;;  %v2837_v49 = vpop.eup %2836  ;;  %v337_v0 = vsub.f32 1.0, %v2835_v45 }
 0x37b   :  { %v420_v50 = vadd.f32 1.0, %v2837_v49 }
 0x37c   :  { %332 = vrot.lane.b32.xlu1 %v330_v46, %s3070_s19 }
 0x37d   :  { %2838 = vrcp.f32 %v420_v50 }
 0x38a   :  { %v2839_v51 = vpop.eup %2838 }
 0x38b   :  { %v433_v5 = vsub.f32 1.0, %v2839_v51  ;;  %v441_v10 = vmul.f32 %v2839_v51, %v439_v4 }
 0x3ce   :  { %v424_v52 = vpop.permute.xlu0 %423 }
 0x3cf   :  { %v426_v53 = vmul.f32 %v2839_v51, %v424_v52 }
 0x3d1   :  { %428 = vrot.lane.b32.xlu0 %v426_v53, %s3070_s19 }
 0x3ee   :  { %v333_v54 = vpop.permute.xlu1 %332 }
 0x3ef   :  { %v335_v55 = vadd.f32 %v333_v54, %v318_v36 }
 0x3f1   :  { %2840 = vtanh.f32 %v335_v55 }
 0x3fe   :  { %v2841_v56 = vpop.eup %2840 }
 0x3ff   :  { %339 = vrot.lane.b32.xlu1 %v2841_v56, %s3073_s12 }
 0x443   :  { %v429_v57 = vpop.permute.xlu0 %428 }
 0x444   :  { %v431_v58 = vadd.f32 %v429_v57, %v3152_v9 }
 0x446   :  { %2842 = vtanh.f32 %v431_v58 }
 0x453   :  { %v2843_v63 = vpop.eup %2842 }
 0x454   :  { %435 = vrot.lane.b32.xlu0 %v2843_v63, %s3073_s12 }
 0x471   :  { %v340_v1 = vpop.permute.xlu1 %339 }
 0x472   :  { %v3281_v2 = vmul.f32 %v340_v1, %v337_v0 }
 0x474   :  { %520 = vrot.lane.b32.xlu1 %v3281_v2, %s3073_s12 }
 0x4c6   :  { %v436_v6 = vpop.permute.xlu0 %435 }
 0x4c7   :  { %v438_v8 = vmul.f32 %v436_v6, %v433_v5 }
 0x4c9   :  { %v3286_v11 = vadd.f32 %v441_v10, %v438_v8 }
 0x4cb   :  { %v444_v12 = vrot.slane %v3286_v11, 2  ;;  %v716_v1 = vrot.slane %v3286_v11, 6 }
 0x4cd   :  { %445 = vrot.lane.b32.xlu0 %v444_v12, %s3073_s12 }
 0x4e6   :  { %v521_v13 = vpop.permute.xlu1 %520 }
 0x4e7   :  { %2601 = vmatmul.mubr.msk.f32.vlgmr.msra.gmra.mxu0 %vm248_vm2, %v521_v13 }
 0x4e8   :  { %2615 = vmatpush3.msra.mxu0 %v3160_v18  ;;  %2622 = vmatprep.mubr.msk.f32.mxu0 %vm3072_vm1, %v3071_v20 }
 0x4e9   :  { %2616 = vmatprep.subr.mxu0 %v3071_v20 }
 0x4ea   :  { %2617 = vmatpush3.msra.mxu0 %v3172_v21 }
 0x4eb   :  { %2618 = vmatprep.subr.mxu0 %v3071_v20 }
 0x4ec   :  { %2619 = vmatpush3.msra.mxu0 %v3186_v23 }
 0x4ed   :  { %2620 = vmatprep.subr.mxu0 %v3071_v20 }
 0x4ee   :  { %2621 = vmatpush3.msra.mxu0 %v3200_v25 }
 0x4ef   :  { %2636 = vmatprep.subr.mxu0 %v3071_v20 }
 0x53f   :  { %v446_v14 = vpop.permute.xlu0 %445 }
 0x540   :  { %2590 = vmatmul.mubr.msk.f32.vlgmr.msra.gmra.mxu1 %vm248_vm2, %v446_v14 }
 0x541   :  { %2604 = vmatpush3.msra.mxu1 %v3165_v19  ;;  %2611 = vmatprep.mubr.msk.f32.mxu1 %vm3072_vm1, %v3071_v20 }
 0x542   :  { %2605 = vmatprep.subr.mxu1 %v3071_v20 }
 0x543   :  { %2606 = vmatpush3.msra.mxu1 %v3177_v22 }
 0x544   :  { %2607 = vmatprep.subr.mxu1 %v3071_v20 }
 0x545   :  { %2608 = vmatpush3.msra.mxu1 %v3191_v24 }
 0x546   :  { %2609 = vmatprep.subr.mxu1 %v3071_v20 }
 0x547   :  { %2610 = vmatpush3.msra.mxu1 %v3207_v26 }
 0x548   :  { %2612 = vmatmul.mubr.msk.f32.vlgmr.msra.gmra.mxu1 %vm248_vm2, %v446_v14  ;;  %2625 = vmatprep.subr.mxu1 %v3071_v20 }
 0x549   :  { %2626 = vmatpush3.msra.mxu1 %v3255_v59  ;;  %2633 = vmatprep.mubr.msk.f32.mxu1 %vm3072_vm1, %v3071_v20 }
 0x54a   :  { %2627 = vmatprep.subr.mxu1 %v3071_v20 }
 0x54b   :  { %2628 = vmatpush3.msra.mxu1 %v3260_v60 }
 0x54c   :  { %2629 = vmatprep.subr.mxu1 %v3071_v20 }
 0x54d   :  { %2630 = vmatpush3.msra.mxu1 %v3267_v61 }
 0x54e   :  { %2631 = vmatprep.subr.mxu1 %v3071_v20 }
 0x54f   :  { %2632 = vmatpush3.msra.mxu1 %v3274_v62 }
 0x550   :  { %2647 = vmatprep.subr.mxu1 %v3071_v20 }
 0x5a7   :  { %v590_v15 = vpop.f32.mrf.mxu0 }
 0x5a8   :  { %v591_v16 = vadd.f32 %v3224_v31, %v590_v15 }
 0x5a9   :  { %v2602_v17 = vpop.f32.mrf.mxu0 }
 0x5aa   :  { %602 = vrot.lane.b32.xlu1 %v591_v16, %s3070_s19 }
 0x600   :  { %v515_v27 = vpop.f32.mrf.mxu1 }
 0x601   :  { %v516_v28 = vadd.f32 %v3242_v33, %v515_v27 }
 0x602   :  { %v2591_v29 = vpop.f32.mrf.mxu1 }
 0x603   :  { %v594_v30 = vadd.f32 %v591_v16, %v516_v28 }
 0x605   :  { %v2400_v32 = vmul.f32 -1.442695, %v594_v30 }
 0x607   :  { %2844 = vpow2.f32 %v2400_v32 }
 0x608   :  { %v686_v34 = vpop.f32.mrf.mxu1 }
 0x609   :  { %v687_v35 = vadd.f32 %v3143_v3, %v686_v34 }
 0x60a   :  { %v2613_v36 = vpop.f32.mrf.mxu1 }
 0x60b   :  { %v691_v37 = vrot.slane %v687_v35, 4 }
 0x60d   :  { %700 = vrot.lane.b32.xlu0 %v691_v37, %s3070_s19  ;;  %v693_v43 = vadd.f32 %v691_v37, %v3152_v9 }
 0x60f   :  { %v2402_v44 = vmul.f32 -1.442695, %v693_v43 }
 0x614   :  { %v2845_v38 = vpop.eup %2844 }
 0x615   :  { %v598_v39 = vadd.f32 1.0, %v2845_v38 }
 0x617   :  { %2846 = vrcp.f32 %v598_v39 }
 0x618   :  { %2848 = vpow2.f32 %v2402_v44 }
 0x61c   :  { %v603_v41 = vpop.permute.xlu1 %602 }
 0x624   :  { %v2847_v40 = vpop.eup %2846 }
 0x625   :  { %v605_v42 = vmul.f32 %v2847_v40, %v603_v41  ;;  %v2849_v45 = vpop.eup %2848  ;;  %v612_v56 = vsub.f32 1.0, %v2847_v40  ;;  %v618_v58 = vmul.f32 %v2847_v40, %v3281_v2 }
 0x626   :  { %v697_v46 = vadd.f32 1.0, %v2849_v45 }
 0x627   :  { %607 = vrot.lane.b32.xlu1 %v605_v42, %s3070_s19 }
 0x628   :  { %2850 = vrcp.f32 %v697_v46 }
 0x635   :  { %v2851_v47 = vpop.eup %2850 }
 0x636   :  { %v710_v4 = vsub.f32 1.0, %v2851_v47  ;;  %v718_v6 = vmul.f32 %v2851_v47, %v716_v1 }
 0x67f   :  { %v701_v48 = vpop.permute.xlu0 %700 }
 0x680   :  { %v703_v49 = vmul.f32 %v2851_v47, %v701_v48 }
 0x682   :  { %705 = vrot.lane.b32.xlu0 %v703_v49, %s3070_s19 }
 0x699   :  { %v608_v50 = vpop.permute.xlu1 %607 }
 0x69a   :  { %v610_v51 = vadd.f32 %v608_v50, %v516_v28 }
 0x69c   :  { %2852 = vtanh.f32 %v610_v51 }
 0x6a9   :  { %v2853_v52 = vpop.eup %2852 }
 0x6aa   :  { %614 = vrot.lane.b32.xlu1 %v2853_v52, %s3073_s12 }
 0x6f4   :  { %v706_v53 = vpop.permute.xlu0 %705 }
 0x6f5   :  { %v708_v54 = vadd.f32 %v706_v53, %v3152_v9 }
 0x6f7   :  { %2854 = vtanh.f32 %v708_v54 }
 0x704   :  { %v2855_v55 = vpop.eup %2854 }
 0x705   :  { %712 = vrot.lane.b32.xlu0 %v2855_v55, %s3073_s12 }
 0x71c   :  { %v615_v57 = vpop.permute.xlu1 %614 }
 0x71d   :  { %v617_v63 = vmul.f32 %v615_v57, %v612_v56 }
 0x71f   :  { %v3335_v0 = vadd.f32 %v618_v58, %v617_v63 }
 0x721   :  { %797 = vrot.lane.b32.xlu1 %v3335_v0, %s3073_s12 }
 0x777   :  { %v713_v5 = vpop.permute.xlu0 %712 }
 0x778   :  { %v715_v8 = vmul.f32 %v713_v5, %v710_v4 }
 0x77a   :  { %v3340_v10 = vadd.f32 %v718_v6, %v715_v8 }
 0x77c   :  { %v721_v12 = vrot.slane %v3340_v10, 4  ;;  %v993_v63 = vrot.slane %v3340_v10, 6 }
 0x77e   :  { %722 = vrot.lane.b32.xlu0 %v721_v12, %s3073_s12 }
 0x793   :  { %v798_v13 = vpop.permute.xlu1 %797 }
 0x794   :  { %2634 = vmatmul.mubr.msk.f32.vlgmr.msra.gmra.mxu1 %vm248_vm2, %v798_v13 }
 0x795   :  { %2648 = vmatpush3.msra.mxu1 %v3160_v18  ;;  %2655 = vmatprep.mubr.msk.f32.mxu1 %vm3072_vm1, %v3071_v20 }
 0x796   :  { %2649 = vmatprep.subr.mxu1 %v3071_v20 }
 0x797   :  { %2650 = vmatpush3.msra.mxu1 %v3172_v21 }
 0x798   :  { %2651 = vmatprep.subr.mxu1 %v3071_v20 }
 0x799   :  { %2652 = vmatpush3.msra.mxu1 %v3186_v23 }
 0x79a   :  { %2653 = vmatprep.subr.mxu1 %v3071_v20 }
 0x79b   :  { %2654 = vmatpush3.msra.mxu1 %v3200_v25 }
 0x79c   :  { %2669 = vmatprep.subr.mxu1 %v3071_v20 }
 0x7f0   :  { %v723_v2 = vpop.permute.xlu0 %722 }
 0x7f1   :  { %2623 = vmatmul.mubr.msk.f32.vlgmr.msra.gmra.mxu0 %vm248_vm2, %v723_v2 }
 0x7f2   :  { %2637 = vmatpush3.msra.mxu0 %v3165_v19  ;;  %2644 = vmatprep.mubr.msk.f32.mxu0 %vm3072_vm1, %v3071_v20 }
 0x7f3   :  { %2638 = vmatprep.subr.mxu0 %v3071_v20 }
 0x7f4   :  { %2639 = vmatpush3.msra.mxu0 %v3177_v22 }
 0x7f5   :  { %2640 = vmatprep.subr.mxu0 %v3071_v20 }
 0x7f6   :  { %2641 = vmatpush3.msra.mxu0 %v3191_v24 }
 0x7f7   :  { %2642 = vmatprep.subr.mxu0 %v3071_v20 }
 0x7f8   :  { %2643 = vmatpush3.msra.mxu0 %v3207_v26 }
 0x7f9   :  { %2645 = vmatmul.mubr.msk.f32.vlgmr.msra.gmra.mxu0 %vm248_vm2, %v723_v2  ;;  %2658 = vmatprep.subr.mxu0 %v3071_v20 }
 0x7fa   :  { %2659 = vmatpush3.msra.mxu0 %v3255_v59  ;;  %2666 = vmatprep.mubr.msk.f32.mxu0 %vm3072_vm1, %v3071_v20 }
 0x7fb   :  { %2660 = vmatprep.subr.mxu0 %v3071_v20 }
 0x7fc   :  { %2661 = vmatpush3.msra.mxu0 %v3260_v60 }
 0x7fd   :  { %2662 = vmatprep.subr.mxu0 %v3071_v20 }
 0x7fe   :  { %2663 = vmatpush3.msra.mxu0 %v3267_v61 }
 0x7ff   :  { %2664 = vmatprep.subr.mxu0 %v3071_v20 }
 0x800   :  { %2665 = vmatpush3.msra.mxu0 %v3274_v62 }
 0x801   :  { %2680 = vmatprep.subr.mxu0 %v3071_v20 }
 0x854   :  { %v867_v11 = vpop.f32.mrf.mxu1 }
 0x855   :  { %v868_v14 = vadd.f32 %v3224_v31, %v867_v11 }
 0x856   :  { %v2635_v15 = vpop.f32.mrf.mxu1 }
 0x857   :  { %879 = vrot.lane.b32.xlu1 %v868_v14, %s3070_s19 }
 0x8b1   :  { %v792_v16 = vpop.f32.mrf.mxu0 }
 0x8b2   :  { %v793_v17 = vadd.f32 %v3242_v33, %v792_v16 }
 0x8b3   :  { %v2624_v27 = vpop.f32.mrf.mxu0 }
 0x8b4   :  { %v871_v28 = vadd.f32 %v868_v14, %v793_v17 }
 0x8b6   :  { %v2405_v29 = vmul.f32 -1.442695, %v871_v28 }
 0x8b8   :  { %2856 = vpow2.f32 %v2405_v29 }
 0x8b9   :  { %v963_v30 = vpop.f32.mrf.mxu0 }
 0x8ba   :  { %v964_v32 = vadd.f32 %v3143_v3, %v963_v30 }
 0x8bb   :  { %v2646_v34 = vpop.f32.mrf.mxu0 }
 0x8bc   :  { %v968_v35 = vrot.slane %v964_v32, 2 }
 0x8be   :  { %977 = vrot.lane.b32.xlu0 %v968_v35, %s3070_s19  ;;  %v970_v41 = vadd.f32 %v968_v35, %v3152_v9 }
 0x8c0   :  { %v2407_v42 = vmul.f32 -1.442695, %v970_v41 }
 0x8c5   :  { %v2857_v36 = vpop.eup %2856 }
 0x8c6   :  { %v875_v37 = vadd.f32 1.0, %v2857_v36 }
 0x8c8   :  { %2858 = vrcp.f32 %v875_v37 }
 0x8c9   :  { %v880_v39 = vpop.permute.xlu1 %879  ;;  %2860 = vpow2.f32 %v2407_v42 }
 0x8d5   :  { %v2859_v38 = vpop.eup %2858 }
 0x8d6   :  { %v882_v40 = vmul.f32 %v2859_v38, %v880_v39  ;;  %v2861_v43 = vpop.eup %2860  ;;  %v889_v54 = vsub.f32 1.0, %v2859_v38  ;;  %v895_v56 = vmul.f32 %v2859_v38, %v3335_v0 }
 0x8d7   :  { %v974_v44 = vadd.f32 1.0, %v2861_v43 }
 0x8d8   :  { %884 = vrot.lane.b32.xlu1 %v882_v40, %s3070_s19 }
 0x8d9   :  { %2862 = vrcp.f32 %v974_v44 }
 0x8e6   :  { %v2863_v45 = vpop.eup %2862 }
 0x8e7   :  { %v987_v1 = vsub.f32 1.0, %v2863_v45  ;;  %v995_v5 = vmul.f32 %v2863_v45, %v993_v63 }
 0x930   :  { %v978_v46 = vpop.permute.xlu0 %977 }
 0x931   :  { %v980_v47 = vmul.f32 %v2863_v45, %v978_v46 }
 0x933   :  { %982 = vrot.lane.b32.xlu0 %v980_v47, %s3070_s19 }
 0x94a   :  { %v885_v48 = vpop.permute.xlu1 %884 }
 0x94b   :  { %v887_v49 = vadd.f32 %v885_v48, %v793_v17 }
 0x94d   :  { %2864 = vtanh.f32 %v887_v49 }
 0x95a   :  { %v2865_v50 = vpop.eup %2864 }
 0x95b   :  { %891 = vrot.lane.b32.xlu1 %v2865_v50, %s3073_s12 }
 0x9a5   :  { %v983_v51 = vpop.permute.xlu0 %982 }
 0x9a6   :  { %v985_v52 = vadd.f32 %v983_v51, %v3152_v9 }
 0x9a8   :  { %2866 = vtanh.f32 %v985_v52 }
 0x9b5   :  { %v2867_v53 = vpop.eup %2866 }
 0x9b6   :  { %989 = vrot.lane.b32.xlu0 %v2867_v53, %s3073_s12 }
 0x9cd   :  { %v892_v55 = vpop.permute.xlu1 %891 }
 0x9ce   :  { %v894_v57 = vmul.f32 %v892_v55, %v889_v54 }
 0x9d0   :  { %v3389_v58 = vadd.f32 %v895_v56, %v894_v57 }
 0x9d2   :  { %1074 = vrot.lane.b32.xlu1 %v3389_v58, %s3073_s12 }
 0xa28   :  { %v990_v4 = vpop.permute.xlu0 %989 }
 0xa29   :  { %v992_v9 = vmul.f32 %v990_v4, %v987_v1 }
 0xa2b   :  { %v3394_v6 = vadd.f32 %v995_v5, %v992_v9 }
 0xa2d   :  { %v998_v8 = vrot.slane %v3394_v6, 6 }
 0xa2f   :  { %999 = vrot.lane.b32.xlu0 %v998_v8, %s3073_s12 }
 0xa44   :  { %v1075_v0 = vpop.permute.xlu1 %1074 }
 0xa45   :  { %2667 = vmatmul.mubr.msk.f32.vlgmr.msra.gmra.mxu0 %vm248_vm2, %v1075_v0 }
 0xa46   :  { %2681 = vmatpush3.msra.mxu0 %v3160_v18  ;;  %2688 = vmatprep.mubr.msk.f32.mxu0 %vm3072_vm1, %v3071_v20 }
 0xa47   :  { %2682 = vmatprep.subr.mxu0 %v3071_v20 }
 0xa48   :  { %2683 = vmatpush3.msra.mxu0 %v3172_v21 }
 0xa49   :  { %2684 = vmatprep.subr.mxu0 %v3071_v20 }
 0xa4a   :  { %2685 = vmatpush3.msra.mxu0 %v3186_v23 }
 0xa4b   :  { %2686 = vmatprep.subr.mxu0 %v3071_v20 }
 0xa4c   :  { %2687 = vmatpush3.msra.mxu0 %v3200_v25 }
 0xa4d   :  { %2702 = vmatprep.subr.mxu0 %v3071_v20 }
 0xaa1   :  { %v1000_v10 = vpop.permute.xlu0 %999 }
 0xaa2   :  { %2656 = vmatmul.mubr.msk.f32.vlgmr.msra.gmra.mxu1 %vm248_vm2, %v1000_v10 }
 0xaa3   :  { %2670 = vmatpush3.msra.mxu1 %v3165_v19  ;;  %2677 = vmatprep.mubr.msk.f32.mxu1 %vm3072_vm1, %v3071_v20 }
 0xaa4   :  { %2671 = vmatprep.subr.mxu1 %v3071_v20 }
 0xaa5   :  { %2672 = vmatpush3.msra.mxu1 %v3177_v22 }
 0xaa6   :  { %2673 = vmatprep.subr.mxu1 %v3071_v20 }
 0xaa7   :  { %2674 = vmatpush3.msra.mxu1 %v3191_v24 }
 0xaa8   :  { %2675 = vmatprep.subr.mxu1 %v3071_v20 }
 0xaa9   :  { %2676 = vmatpush3.msra.mxu1 %v3207_v26 }
 0xaaa   :  { %2678 = vmatmul.mubr.msk.f32.vlgmr.msra.gmra.mxu1 %vm248_vm2, %v1000_v10  ;;  %2691 = vmatprep.subr.mxu1 %v3071_v20 }
 0xaab   :  { %2692 = vmatpush3.msra.mxu1 %v3255_v59  ;;  %2699 = vmatprep.mubr.msk.f32.mxu1 %vm3072_vm1, %v3071_v20 }
 0xaac   :  { %2693 = vmatprep.subr.mxu1 %v3071_v20 }
 0xaad   :  { %2694 = vmatpush3.msra.mxu1 %v3260_v60 }
 0xaae   :  { %2695 = vmatprep.subr.mxu1 %v3071_v20 }
 0xaaf   :  { %2696 = vmatpush3.msra.mxu1 %v3267_v61 }
 0xab0   :  { %2697 = vmatprep.subr.mxu1 %v3071_v20 }
 0xab1   :  { %2698 = vmatpush3.msra.mxu1 %v3274_v62 }
 0xab2   :  { %2713 = vmatprep.subr.mxu1 %v3071_v20 }
 0xb05   :  { %v1144_v12 = vpop.f32.mrf.mxu0 }
 0xb06   :  { %v1145_v13 = vadd.f32 %v3224_v31, %v1144_v12 }
 0xb07   :  { %v2668_v2 = vpop.f32.mrf.mxu0 }
 0xb08   :  { %1156 = vrot.lane.b32.xlu1 %v1145_v13, %s3070_s19 }
 0xb62   :  { %v1069_v11 = vpop.f32.mrf.mxu1 }
 0xb63   :  { %v1070_v14 = vadd.f32 %v3242_v33, %v1069_v11 }
 0xb64   :  { %v2657_v15 = vpop.f32.mrf.mxu1 }
 0xb65   :  { %v1148_v16 = vadd.f32 %v1145_v13, %v1070_v14 }
 0xb67   :  { %v2410_v17 = vmul.f32 -1.442695, %v1148_v16 }
 0xb69   :  { %2868 = vpow2.f32 %v2410_v17 }
 0xb6a   :  { %v1240_v27 = vpop.f32.mrf.mxu1 }
 0xb6b   :  { %v1241_v28 = vadd.f32 %v3143_v3, %v1240_v27 }
 0xb6c   :  { %v2679_v29 = vpop.f32.mrf.mxu1 }
 0xb6d   :  { %1252 = vrot.lane.b32.xlu0 %v1241_v28, %s3070_s19  ;;  %v1244_v37 = vadd.f32 %v1241_v28, %v3150_v7 }
 0xb6f   :  { %v2412_v38 = vmul.f32 -1.442695, %v1244_v37 }
 0xb76   :  { %v2869_v30 = vpop.eup %2868 }
 0xb77   :  { %v1152_v32 = vadd.f32 1.0, %v2869_v30 }
 0xb79   :  { %2870 = vrcp.f32 %v1152_v32 }
 0xb7a   :  { %v1157_v35 = vpop.permute.xlu1 %1156  ;;  %2872 = vpow2.f32 %v2412_v38 }
 0xb86   :  { %v2871_v34 = vpop.eup %2870 }
 0xb87   :  { %v1159_v36 = vmul.f32 %v2871_v34, %v1157_v35  ;;  %v2873_v39 = vpop.eup %2872  ;;  %v1166_v50 = vsub.f32 1.0, %v2871_v34  ;;  %v1172_v52 = vmul.f32 %v2871_v34, %v3389_v58 }
 0xb88   :  { %v1248_v40 = vadd.f32 1.0, %v2873_v39 }
 0xb89   :  { %1161 = vrot.lane.b32.xlu1 %v1159_v36, %s3070_s19 }
 0xb8a   :  { %2874 = vrcp.f32 %v1248_v40 }
 0xb97   :  { %v2875_v41 = vpop.eup %2874 }
 0xb98   :  { %v1262_v55 = vsub.f32 1.0, %v2875_v41  ;;  %v1269_v57 = vmul.f32 %v2875_v41, %v998_v8 }
 0xbdf   :  { %v1253_v42 = vpop.permute.xlu0 %1252 }
 0xbe0   :  { %v1255_v43 = vmul.f32 %v2875_v41, %v1253_v42 }
 0xbe2   :  { %1257 = vrot.lane.b32.xlu0 %v1255_v43, %s3070_s19 }
 0xbfb   :  { %v1162_v44 = vpop.permute.xlu1 %1161 }
 0xbfc   :  { %v1164_v45 = vadd.f32 %v1162_v44, %v1070_v14 }
 0xbfe   :  { %2876 = vtanh.f32 %v1164_v45 }
 0xc0b   :  { %v2877_v46 = vpop.eup %2876 }
 0xc0c   :  { %1168 = vrot.lane.b32.xlu1 %v2877_v46, %s3073_s12 }
 0xc54   :  { %v1258_v47 = vpop.permute.xlu0 %1257 }
 0xc55   :  { %v1260_v48 = vadd.f32 %v1258_v47, %v3150_v7 }
 0xc57   :  { %2878 = vtanh.f32 %v1260_v48 }
 0xc64   :  { %v2879_v49 = vpop.eup %2878 }
 0xc65   :  { %1264 = vrot.lane.b32.xlu0 %v2879_v49, %s3073_s12 }
 0xc7e   :  { %v1169_v51 = vpop.permute.xlu1 %1168 }
 0xc7f   :  { %v1171_v53 = vmul.f32 %v1169_v51, %v1166_v50 }
 0xc81   :  { %v3445_v54 = vadd.f32 %v1172_v52, %v1171_v53 }
 0xc83   :  { %1347 = vrot.lane.b32.xlu1 %v3445_v54, %s3073_s12 }
 0xcd7   :  { %v1265_v56 = vpop.permute.xlu0 %1264 }
 0xcd8   :  { %v1267_v63 = vmul.f32 %v1265_v56, %v1262_v55 }
 0xcda   :  { %v3451_v1 = vadd.f32 %v1269_v57, %v1267_v63 }
 0xcdc   :  { %1272 = vrot.lane.b32.xlu0 %v3451_v1, %s3073_s12  ;;  %v1543_v49 = vrot.slane %v3451_v1, 6  ;;  %v3545_v1 = vld [vmem:[#allocation8] ss:$0 sm:$0xff] }
 0xcf5   :  { %v1348_v4 = vpop.permute.xlu1 %1347 }
 0xcf6   :  { %2700 = vmatmul.mubr.msk.f32.vlgmr.msra.gmra.mxu1 %vm248_vm2, %v1348_v4 }
 0xcf7   :  { %2714 = vmatpush3.msra.mxu1 %v3160_v18  ;;  %2721 = vmatprep.mubr.msk.f32.mxu1 %vm3072_vm1, %v3071_v20 }
 0xcf8   :  { %2715 = vmatprep.subr.mxu1 %v3071_v20 }
 0xcf9   :  { %2716 = vmatpush3.msra.mxu1 %v3172_v21 }
 0xcfa   :  { %2717 = vmatprep.subr.mxu1 %v3071_v20 }
 0xcfb   :  { %2718 = vmatpush3.msra.mxu1 %v3186_v23 }
 0xcfc   :  { %2719 = vmatprep.subr.mxu1 %v3071_v20 }
 0xcfd   :  { %2720 = vmatpush3.msra.mxu1 %v3200_v25 }
 0xcfe   :  { %2735 = vmatprep.subr.mxu1 %v3071_v20 }
 0xd4e   :  { %v1273_v58 = vpop.permute.xlu0 %1272 }
 0xd4f   :  { %2689 = vmatmul.mubr.msk.f32.vlgmr.msra.gmra.mxu0 %vm248_vm2, %v1273_v58 }
 0xd50   :  { %2703 = vmatpush3.msra.mxu0 %v3165_v19  ;;  %2710 = vmatprep.mubr.msk.f32.mxu0 %vm3072_vm1, %v3071_v20 }
 0xd51   :  { %2704 = vmatprep.subr.mxu0 %v3071_v20 }
 0xd52   :  { %2705 = vmatpush3.msra.mxu0 %v3177_v22 }
 0xd53   :  { %2706 = vmatprep.subr.mxu0 %v3071_v20 }
 0xd54   :  { %2707 = vmatpush3.msra.mxu0 %v3191_v24 }
 0xd55   :  { %2708 = vmatprep.subr.mxu0 %v3071_v20 }
 0xd56   :  { %2709 = vmatpush3.msra.mxu0 %v3207_v26 }
 0xd57   :  { %2711 = vmatmul.mubr.msk.f32.vlgmr.msra.gmra.mxu0 %vm248_vm2, %v1273_v58  ;;  %2724 = vmatprep.subr.mxu0 %v3071_v20 }
 0xd58   :  { %2725 = vmatpush3.msra.mxu0 %v3255_v59  ;;  %2732 = vmatprep.mubr.msk.f32.mxu0 %vm3072_vm1, %v3071_v20 }
 0xd59   :  { %2726 = vmatprep.subr.mxu0 %v3071_v20 }
 0xd5a   :  { %2727 = vmatpush3.msra.mxu0 %v3260_v60 }
 0xd5b   :  { %2728 = vmatprep.subr.mxu0 %v3071_v20 }
 0xd5c   :  { %2729 = vmatpush3.msra.mxu0 %v3267_v61 }
 0xd5d   :  { %2730 = vmatprep.subr.mxu0 %v3071_v20 }
 0xd5e   :  { %2731 = vmatpush3.msra.mxu0 %v3274_v62 }
 0xd5f   :  { %2746 = vmatprep.subr.mxu0 %v3071_v20 }
 0xdb6   :  { %v1417_v5 = vpop.f32.mrf.mxu1 }
 0xdb7   :  { %v1418_v9 = vadd.f32 %v3224_v31, %v1417_v5 }
 0xdb8   :  { %v2701_v6 = vpop.f32.mrf.mxu1 }
 0xdb9   :  { %1429 = vrot.lane.b32.xlu0 %v1418_v9, %s3070_s19 }
 0xe0f   :  { %v1342_v8 = vpop.f32.mrf.mxu0 }
 0xe10   :  { %v1343_v0 = vadd.f32 %v3242_v33, %v1342_v8 }
 0xe11   :  { %v2690_v10 = vpop.f32.mrf.mxu0 }
 0xe12   :  { %v1421_v12 = vadd.f32 %v1418_v9, %v1343_v0 }
 0xe14   :  { %v2415_v13 = vmul.f32 -1.442695, %v1421_v12 }
 0xe16   :  { %2880 = vpow2.f32 %v2415_v13 }
 0xe17   :  { %v1513_v2 = vpop.f32.mrf.mxu0 }
 0xe18   :  { %v1514_v11 = vadd.f32 %v3143_v3, %v1513_v2 }
 0xe19   :  { %v2712_v14 = vpop.f32.mrf.mxu0 }
 0xe1a   :  { %v1518_v15 = vrot.slane %v1514_v11, 6 }
 0xe1c   :  { %1527 = vrot.lane.b32.xlu1 %v1518_v15, %s3070_s19  ;;  %v1520_v30 = vadd.f32 %v1518_v15, %v3150_v7 }
 0xe1e   :  { %v2417_v32 = vmul.f32 -1.442695, %v1520_v30 }
 0xe23   :  { %v2881_v16 = vpop.eup %2880 }
 0xe24   :  { %v1425_v17 = vadd.f32 1.0, %v2881_v16 }
 0xe26   :  { %2882 = vrcp.f32 %v1425_v17 }
 0xe27   :  { %2884 = vpow2.f32 %v2417_v32 }
 0xe2b   :  { %v1430_v28 = vpop.permute.xlu0 %1429 }
 0xe33   :  { %v2883_v27 = vpop.eup %2882 }
 0xe34   :  { %v1432_v29 = vmul.f32 %v2883_v27, %v1430_v28  ;;  %v2885_v34 = vpop.eup %2884  ;;  %v1439_v44 = vsub.f32 1.0, %v2883_v27  ;;  %v1445_v46 = vmul.f32 %v2883_v27, %v3445_v54 }
 0xe35   :  { %v1524_v35 = vadd.f32 1.0, %v2885_v34 }
 0xe36   :  { %1434 = vrot.lane.b32.xlu0 %v1432_v29, %s3070_s19 }
 0xe37   :  { %2886 = vrcp.f32 %v1524_v35 }
 0xe44   :  { %v2887_v3 = vpop.eup %2886 }
 0xe45   :  { %v1537_v50 = vsub.f32 1.0, %v2887_v3  ;;  %v1545_v53 = vmul.f32 %v2887_v3, %v1543_v49  ;;  %v2927_v49 = vld [vmem:[%s3662_s5 + $0x18] sm:$0xff] }
 0xe8e   :  { %v1528_v36 = vpop.permute.xlu1 %1527 }
 0xe8f   :  { %v1530_v37 = vmul.f32 %v2887_v3, %v1528_v36 }
 0xe91   :  { %1532 = vrot.lane.b32.xlu1 %v1530_v37, %s3070_s19 }
 0xea8   :  { %v1435_v38 = vpop.permute.xlu0 %1434 }
 0xea9   :  { %v1437_v39 = vadd.f32 %v1435_v38, %v1343_v0 }
 0xeab   :  { %2888 = vtanh.f32 %v1437_v39 }
 0xeb8   :  { %v2889_v40 = vpop.eup %2888 }
 0xeb9   :  { %1441 = vrot.lane.b32.xlu0 %v2889_v40, %s3073_s12 }
 0xf03   :  { %v1533_v41 = vpop.permute.xlu1 %1532 }
 0xf04   :  { %v1535_v42 = vadd.f32 %v1533_v41, %v3150_v7 }
 0xf06   :  { %2890 = vtanh.f32 %v1535_v42 }
 0xf13   :  { %v2891_v43 = vpop.eup %2890 }
 0xf14   :  { %1539 = vrot.lane.b32.xlu1 %v2891_v43, %s3073_s12 }
 0xf2b   :  { %v1442_v45 = vpop.permute.xlu0 %1441 }
 0xf2c   :  { %v1444_v47 = vmul.f32 %v1442_v45, %v1439_v44  ;;  %v2923_v44 = vld [vmem:[%s3660_s3 + $0x18] sm:$0xff]  ;;  %v2924_v45 = vld [vmem:[%s3660_s3 + $0x10] sm:$0xff] }
 0xf2e   :  { %v3500_v48 = vadd.f32 %v1445_v46, %v1444_v47  ;;  %v2925_v46 = vld [vmem:[%s3660_s3 + $0x8] sm:$0xff]  ;;  %v2926_v47 = vld [vmem:[%s3660_s3] sm:$0xff] }
 0xf30   :  { %1624 = vrot.lane.b32.xlu0 %v3500_v48, %s3073_s12 }
 0xf86   :  { %v1540_v51 = vpop.permute.xlu1 %1539 }
 0xf87   :  { %v1542_v52 = vmul.f32 %v1540_v51, %v1537_v50  ;;  %v2928_v50 = vld [vmem:[%s3662_s5 + $0x10] sm:$0xff]  ;;  %v2929_v51 = vld [vmem:[%s3662_s5 + $0x8] sm:$0xff] }
 0xf89   :  { %v3505_v55 = vadd.f32 %v1545_v53, %v1542_v52  ;;  %v2930_v52 = vld [vmem:[%s3662_s5] sm:$0xff] }
 0xf8b   :  { %v1548_v56 = vrot.slane %v3505_v55, 2  ;;  %v1820_v36 = vrot.slane %v3505_v55, 6  ;;  %v3613_v55 = vld [vmem:[#allocation8 + $0x1] ss:$0 sm:$0xff] }
 0xf8d   :  { %1549 = vrot.lane.b32.xlu1 %v1548_v56, %s3073_s12 }
 0xfa2   :  { %v1625_v57 = vpop.permute.xlu0 %1624 }
 0xfa3   :  { %2733 = vmatmul.mubr.msk.f32.vlgmr.msra.gmra.mxu0 %vm248_vm2, %v1625_v57 }
 0xfa4   :  { %2747 = vmatpush3.msra.mxu0 %v3160_v18  ;;  %2754 = vmatprep.mubr.msk.f32.mxu0 %vm3072_vm1, %v3071_v20 }
 0xfa5   :  { %2748 = vmatprep.subr.mxu0 %v3071_v20 }
 0xfa6   :  { %2749 = vmatpush3.msra.mxu0 %v3172_v21 }
 0xfa7   :  { %2750 = vmatprep.subr.mxu0 %v3071_v20 }
 0xfa8   :  { %2751 = vmatpush3.msra.mxu0 %v3186_v23 }
 0xfa9   :  { %2752 = vmatprep.subr.mxu0 %v3071_v20 }
 0xfaa   :  { %2753 = vmatpush3.msra.mxu0 %v3200_v25 }
 0xfab   :  { %2768 = vmatprep.subr.mxu0 %v3071_v20 }
 0xfff   :  { %v1550_v54 = vpop.permute.xlu1 %1549 }
0x1000   :  { %2722 = vmatmul.mubr.msk.f32.vlgmr.msra.gmra.mxu1 %vm248_vm2, %v1550_v54 }
0x1001   :  { %2736 = vmatpush3.msra.mxu1 %v3165_v19  ;;  %2743 = vmatprep.mubr.msk.f32.mxu1 %vm3072_vm1, %v3071_v20 }
0x1002   :  { %2737 = vmatprep.subr.mxu1 %v3071_v20 }
0x1003   :  { %2738 = vmatpush3.msra.mxu1 %v3177_v22 }
0x1004   :  { %2739 = vmatprep.subr.mxu1 %v3071_v20 }
0x1005   :  { %2740 = vmatpush3.msra.mxu1 %v3191_v24 }
0x1006   :  { %2741 = vmatprep.subr.mxu1 %v3071_v20 }
0x1007   :  { %2742 = vmatpush3.msra.mxu1 %v3207_v26 }
0x1008   :  { %2744 = vmatmul.mubr.msk.f32.vlgmr.msra.gmra.mxu1 %vm248_vm2, %v1550_v54  ;;  %2757 = vmatprep.subr.mxu1 %v3071_v20  ;;  %v2932_v54 = vld [vmem:[#allocation7] ss:$0 sm:$0xff] }
0x1009   :  { %2758 = vmatpush3.msra.mxu1 %v3255_v59  ;;  %2765 = vmatprep.mubr.msk.f32.mxu1 %vm3072_vm1, %v3071_v20 }
0x100a   :  { %2759 = vmatprep.subr.mxu1 %v3071_v20 }
0x100b   :  { %2760 = vmatpush3.msra.mxu1 %v3260_v60 }
0x100c   :  { %2761 = vmatprep.subr.mxu1 %v3071_v20 }
0x100d   :  { %2762 = vmatpush3.msra.mxu1 %v3267_v61 }
0x100e   :  { %2763 = vmatprep.subr.mxu1 %v3071_v20 }
0x100f   :  { %2764 = vmatpush3.msra.mxu1 %v3274_v62 }
0x1010   :  { %2779 = vmatprep.subr.mxu1 %v3071_v20 }
0x1063   :  { %v1694_v18 = vpop.f32.mrf.mxu0 }
0x1064   :  { %v1695_v19 = vadd.f32 %v3224_v31, %v1694_v18 }
0x1065   :  { %v2734_v21 = vpop.f32.mrf.mxu0 }
0x1066   :  { %1706 = vrot.lane.b32.xlu0 %v1695_v19, %s3070_s19 }
0x10c0   :  { %v1619_v22 = vpop.f32.mrf.mxu1 }
0x10c1   :  { %v1620_v23 = vadd.f32 %v3242_v33, %v1619_v22 }
0x10c2   :  { %v2723_v24 = vpop.f32.mrf.mxu1 }
0x10c3   :  { %v1698_v25 = vadd.f32 %v1695_v19, %v1620_v23 }
0x10c5   :  { %v2420_v26 = vmul.f32 -1.442695, %v1698_v25 }
0x10c7   :  { %2892 = vpow2.f32 %v2420_v26 }
0x10c8   :  { %v1790_v63 = vpop.f32.mrf.mxu1 }
0x10c9   :  { %v1791_v4 = vadd.f32 %v3545_v1, %v1790_v63 }
0x10ca   :  { %v2745_v58 = vpop.f32.mrf.mxu1 }
0x10cb   :  { %v1795_v5 = vrot.slane %v1791_v4, 4 }
0x10cd   :  { %1804 = vrot.lane.b32.xlu1 %v1795_v5, %s3070_s19  ;;  %v1797_v33 = vadd.f32 %v1795_v5, %v3150_v7 }
0x10cf   :  { %v2422_v10 = vmul.f32 -1.442695, %v1797_v33 }
0x10d4   :  { %v2893_v31 = vpop.eup %2892 }
0x10d5   :  { %v1702_v9 = vadd.f32 1.0, %v2893_v31 }
0x10d7   :  { %2894 = vrcp.f32 %v1702_v9 }
0x10d8   :  { %v1707_v8 = vpop.permute.xlu0 %1706  ;;  %2896 = vpow2.f32 %v2422_v10 }
0x10e4   :  { %v2895_v6 = vpop.eup %2894 }
0x10e5   :  { %v1709_v0 = vmul.f32 %v2895_v6, %v1707_v8  ;;  %v2897_v12 = vpop.eup %2896  ;;  %v1716_v30 = vsub.f32 1.0, %v2895_v6  ;;  %v1722_v34 = vmul.f32 %v2895_v6, %v3500_v48 }
0x10e6   :  { %v1801_v13 = vadd.f32 1.0, %v2897_v12 }
0x10e7   :  { %1711 = vrot.lane.b32.xlu0 %v1709_v0, %s3070_s19 }
0x10e8   :  { %2898 = vrcp.f32 %v1801_v13 }
0x10f5   :  { %v2899_v2 = vpop.eup %2898 }
0x10f6   :  { %v1814_v37 = vsub.f32 1.0, %v2899_v2  ;;  %v1822_v39 = vmul.f32 %v2899_v2, %v1820_v36 }
0x113f   :  { %v1805_v11 = vpop.permute.xlu1 %1804 }
0x1140   :  { %v1807_v14 = vmul.f32 %v2899_v2, %v1805_v11 }
0x1142   :  { %1809 = vrot.lane.b32.xlu1 %v1807_v14, %s3070_s19 }
0x1159   :  { %v1712_v15 = vpop.permute.xlu0 %1711 }
0x115a   :  { %v1714_v16 = vadd.f32 %v1712_v15, %v1620_v23 }
0x115c   :  { %2900 = vtanh.f32 %v1714_v16 }
0x1169   :  { %v2901_v17 = vpop.eup %2900 }
0x116a   :  { %1718 = vrot.lane.b32.xlu0 %v2901_v17, %s3073_s12 }
0x11b4   :  { %v1810_v27 = vpop.permute.xlu1 %1809 }
0x11b5   :  { %v1812_v28 = vadd.f32 %v1810_v27, %v3150_v7 }
0x11b7   :  { %2902 = vtanh.f32 %v1812_v28 }
0x11c4   :  { %v2903_v29 = vpop.eup %2902 }
0x11c5   :  { %1816 = vrot.lane.b32.xlu1 %v2903_v29, %s3073_s12 }
0x11dc   :  { %v1719_v32 = vpop.permute.xlu0 %1718 }
0x11dd   :  { %v1721_v35 = vmul.f32 %v1719_v32, %v1716_v30 }
0x11df   :  { %v3556_v3 = vadd.f32 %v1722_v34, %v1721_v35 }
0x11e1   :  { %1901 = vrot.lane.b32.xlu0 %v3556_v3, %s3073_s12 }
0x1237   :  { %v1817_v38 = vpop.permute.xlu1 %1816 }
0x1238   :  { %v1819_v40 = vmul.f32 %v1817_v38, %v1814_v37 }
0x123a   :  { %v3561_v41 = vadd.f32 %v1822_v39, %v1819_v40 }
0x123c   :  { %v1825_v42 = vrot.slane %v3561_v41, 4  ;;  %v2097_v27 = vrot.slane %v3561_v41, 6 }
0x123e   :  { %1826 = vrot.lane.b32.xlu1 %v1825_v42, %s3073_s12 }
0x1253   :  { %v1902_v43 = vpop.permute.xlu0 %1901 }
0x1254   :  { %2766 = vmatmul.mubr.msk.f32.vlgmr.msra.gmra.mxu1 %vm248_vm2, %v1902_v43 }
0x1255   :  { %2780 = vmatpush3.msra.mxu1 %v2923_v44  ;;  %2787 = vmatprep.mubr.msk.f32.mxu1 %vm3072_vm1, %v3071_v20 }
0x1256   :  { %2781 = vmatprep.subr.mxu1 %v3071_v20 }
0x1257   :  { %2782 = vmatpush3.msra.mxu1 %v2924_v45 }
0x1258   :  { %2783 = vmatprep.subr.mxu1 %v3071_v20 }
0x1259   :  { %2784 = vmatpush3.msra.mxu1 %v2925_v46 }
0x125a   :  { %2785 = vmatprep.subr.mxu1 %v3071_v20 }
0x125b   :  { %2786 = vmatpush3.msra.mxu1 %v2926_v47 }
0x125c   :  { %2801 = vmatprep.subr.mxu1 %v3071_v20 }
0x12b0   :  { %v1827_v48 = vpop.permute.xlu1 %1826 }
0x12b1   :  { %2755 = vmatmul.mubr.msk.f32.vlgmr.msra.gmra.mxu0 %vm248_vm2, %v1827_v48 }
0x12b2   :  { %2769 = vmatpush3.msra.mxu0 %v2927_v49  ;;  %2776 = vmatprep.mubr.msk.f32.mxu0 %vm3072_vm1, %v3071_v20 }
0x12b3   :  { %2770 = vmatprep.subr.mxu0 %v3071_v20 }
0x12b4   :  { %2771 = vmatpush3.msra.mxu0 %v2928_v50 }
0x12b5   :  { %2772 = vmatprep.subr.mxu0 %v3071_v20 }
0x12b6   :  { %2773 = vmatpush3.msra.mxu0 %v2929_v51  ;;  %v2281_v51 = vld [vmem:[%s3664_s7 + $0x18] sm:$0xff] }
0x12b7   :  { %2774 = vmatprep.subr.mxu0 %v3071_v20 }
0x12b8   :  { %2775 = vmatpush3.msra.mxu0 %v2930_v52  ;;  %v2280_v52 = vld [vmem:[%s3664_s7 + $0x10] sm:$0xff] }
0x12b9   :  { %2777 = vmatmul.mubr.msk.f32.vlgmr.msra.gmra.mxu0 %vm248_vm2, %v1827_v48  ;;  %2790 = vmatprep.subr.mxu0 %v3071_v20 }
0x12ba   :  { %2791 = vmatpush3.msra.mxu0 %v3255_v59  ;;  %2798 = vmatprep.mubr.msk.f32.mxu0 %vm3072_vm1, %v3071_v20 }
0x12bb   :  { %2792 = vmatprep.subr.mxu0 %v3071_v20 }
0x12bc   :  { %2793 = vmatpush3.msra.mxu0 %v3260_v60 }
0x12bd   :  { %2794 = vmatprep.subr.mxu0 %v3071_v20 }
0x12be   :  { %2795 = vmatpush3.msra.mxu0 %v3267_v61 }
0x12bf   :  { %2796 = vmatprep.subr.mxu0 %v3071_v20 }
0x12c0   :  { %2797 = vmatpush3.msra.mxu0 %v3274_v62 }
0x1314   :  { %v1971_v53 = vpop.f32.mrf.mxu1 }
0x1315   :  { %v1972_v59 = vadd.f32 %v3613_v55, %v1971_v53  ;;  %v2279_v53 = vld [vmem:[%s3664_s7 + $0x8] sm:$0xff] }
0x1316   :  { %v2767_v56 = vpop.f32.mrf.mxu1 }
0x1317   :  { %1983 = vrot.lane.b32.xlu0 %v1972_v59, %s3070_s19 }
0x1371   :  { %v1896_v57 = vpop.f32.mrf.mxu0 }
0x1372   :  { %v1897_v18 = vadd.f32 %v2932_v54, %v1896_v57 }
0x1373   :  { %v2756_v60 = vpop.f32.mrf.mxu0 }
0x1374   :  { %v1975_v19 = vadd.f32 %v1972_v59, %v1897_v18 }
0x1376   :  { %v2425_v21 = vmul.f32 -1.442695, %v1975_v19 }
0x1378   :  { %2904 = vpow2.f32 %v2425_v21  ;;  %v2431_v21 = vld [vmem:[#allocation10] ss:$0 sm:$0xff] }
0x1379   :  { %v2067_v61 = vpop.f32.mrf.mxu0 }
0x137a   :  { %v2068_v22 = vadd.f32 %v3545_v1, %v2067_v61 }
0x137b   :  { %v2778_v23 = vpop.f32.mrf.mxu0 }
0x137c   :  { %v2072_v62 = vrot.slane %v2068_v22, 2 }
0x137e   :  { %2081 = vrot.lane.b32.xlu1 %v2072_v62, %s3070_s19  ;;  %v2074_v58 = vadd.f32 %v2072_v62, %v3150_v7 }
0x1380   :  { %v2427_v5 = vmul.f32 -1.442695, %v2074_v58 }
0x1385   :  { %v2905_v24 = vpop.eup %2904 }
0x1386   :  { %v1979_v25 = vadd.f32 1.0, %v2905_v24 }
0x1388   :  { %2906 = vrcp.f32 %v1979_v25 }
0x1389   :  { %v1984_v63 = vpop.permute.xlu0 %1983  ;;  %2908 = vpow2.f32 %v2427_v5 }
0x1395   :  { %v2907_v26 = vpop.eup %2906 }
0x1396   :  { %v1986_v4 = vmul.f32 %v2907_v26, %v1984_v63  ;;  %v2909_v31 = vpop.eup %2908  ;;  %v1993_v11 = vsub.f32 1.0, %v2907_v26  ;;  %v1999_v15 = vmul.f32 %v2907_v26, %v3556_v3 }
0x1397   :  { %v2078_v9 = vadd.f32 1.0, %v2909_v31 }
0x1398   :  { %1988 = vrot.lane.b32.xlu0 %v1986_v4, %s3070_s19 }
0x1399   :  { %2910 = vrcp.f32 %v2078_v9 }
0x13a6   :  { %v2911_v1 = vpop.eup %2910 }
0x13a7   :  { %v2091_v28 = vsub.f32 1.0, %v2911_v1  ;;  %v2099_v30 = vmul.f32 %v2911_v1, %v2097_v27 }
0x13f0   :  { %v2082_v6 = vpop.permute.xlu1 %2081 }
0x13f1   :  { %v2084_v8 = vmul.f32 %v2911_v1, %v2082_v6 }
0x13f3   :  { %2086 = vrot.lane.b32.xlu1 %v2084_v8, %s3070_s19 }
0x140a   :  { %v1989_v0 = vpop.permute.xlu0 %1988 }
0x140b   :  { %v1991_v33 = vadd.f32 %v1989_v0, %v1897_v18 }
0x140d   :  { %2912 = vtanh.f32 %v1991_v33 }
0x141a   :  { %v2913_v10 = vpop.eup %2912 }
0x141b   :  { %1995 = vrot.lane.b32.xlu0 %v2913_v10, %s3073_s12 }
0x1465   :  { %v2087_v12 = vpop.permute.xlu1 %2086 }
0x1466   :  { %v2089_v13 = vadd.f32 %v2087_v12, %v3150_v7 }
0x1468   :  { %2914 = vtanh.f32 %v2089_v13 }
0x1475   :  { %v2915_v2 = vpop.eup %2914 }
0x1476   :  { %2093 = vrot.lane.b32.xlu1 %v2915_v2, %s3073_s12 }
0x148d   :  { %v1996_v14 = vpop.permute.xlu0 %1995 }
0x148e   :  { %v1998_v16 = vmul.f32 %v1996_v14, %v1993_v11 }
0x1490   :  { %v2000_v17 = vadd.f32 %v1999_v15, %v1998_v16 }
0x1492   :  { %2178 = vrot.lane.b32.xlu0 %v2000_v17, %s3073_s12 }
0x14e8   :  { %v2094_v29 = vpop.permute.xlu1 %2093 }
0x14e9   :  { %v2096_v32 = vmul.f32 %v2094_v29, %v2091_v28 }
0x14eb   :  { %v2100_v34 = vadd.f32 %v2099_v30, %v2096_v32 }
0x14ed   :  { %v2102_v7 = vrot.slane %v2100_v34, 6 }
0x14ef   :  { %2103 = vrot.lane.b32.xlu1 %v2102_v7, %s3073_s12 }
0x1504   :  { %v2179_v35 = vpop.permute.xlu0 %2178 }
0x1505   :  { %2799 = vmatmul.mubr.msk.f32.vlgmr.msra.gmra.mxu0 %vm248_vm2, %v2179_v35 }
0x1561   :  { %v2104_v36 = vpop.permute.xlu1 %2103 }
0x1562   :  { %2788 = vmatmul.mubr.msk.f32.vlgmr.msra.gmra.mxu1 %vm248_vm2, %v2104_v36 }
0x1563   :  { %2809 = vmatprep.mubr.msk.f32.mxu1 %vm3072_vm1, %v3071_v20  ;;  %2802 = vmatpush3.msra.mxu1 %v2281_v51 }
0x1564   :  { %2803 = vmatprep.subr.mxu1 %v3071_v20 }
0x1565   :  { %2804 = vmatpush3.msra.mxu1 %v2280_v52 }
0x1566   :  { %2805 = vmatprep.subr.mxu1 %v3071_v20 }
0x1567   :  { %2806 = vmatpush3.msra.mxu1 %v2279_v53 }
0x1568   :  { %2807 = vmatprep.subr.mxu1 %v3071_v20 }
0x15c5   :  { %v2248_v3 = vpop.f32.mrf.mxu0 }
0x15c6   :  { %v2249_v37 = vadd.f32 %v3613_v55, %v2248_v3  ;;  %v2278_v55 = vld [vmem:[%s3664_s7] sm:$0xff]  ;;  %s2372_s7 = sshll.u32 %s3074_s16, 4  ;;  %s2373_s7 = int_to_ptr.vmem [resolvable:$true] %s2372_s7 }
0x15c7   :  { %v2800_v38 = vpop.f32.mrf.mxu0  ;;  %2808 = vmatpush3.msra.mxu1 %v2278_v55  ;;  %s3033_s4 = scalar_lea.vmem %s2373_s7, 32  ;;  %p3038_p12 = scmp.lt.s32.totalorder %s2373_s7, %s2373_s7 }
0x15c8   :  { %2260 = vrot.lane.b32.xlu0 %v2249_v37, %s3070_s19  ;;  %p3034_p11 = scmp.ne.s32.totalorder %s2373_s7, %s3033_s4  ;;  %p3039_p13 = scmp.lt.s32.totalorder %s3033_s4, %s3033_s4 }
0x15ca   :  { %p3040_p0 = por %p3039_p13, %p3038_p12 }
0x15cc   :  { %p3041_p1 = pnand %p3040_p0, %p3034_p11 }
0x1622   :  { %v2173_v39 = vpop.f32.mrf.mxu1 }
0x1623   :  { %v2174_v40 = vadd.f32 %v2932_v54, %v2173_v39 }
0x1624   :  { %v2789_v41 = vpop.f32.mrf.mxu1 }
0x1625   :  { %v2252_v42 = vadd.f32 %v2249_v37, %v2174_v40 }
0x1627   :  { %v2430_v43 = vmul.f32 -1.442695, %v2252_v42 }
0x1629   :  { %2916 = vpow2.f32 %v2430_v43 }
0x1636   :  { %v2917_v44 = vpop.eup %2916 }
0x1637   :  { %v2256_v45 = vadd.f32 1.0, %v2917_v44 }
0x1639   :  { %2918 = vrcp.f32 %v2256_v45 }
0x163a   :  { %v2261_v47 = vpop.permute.xlu0 %2260 }
0x1646   :  { %v2919_v46 = vpop.eup %2918 }
0x1647   :  { %v2263_v48 = vmul.f32 %v2919_v46, %v2261_v47  ;;  %v2270_v56 = vsub.f32 1.0, %v2919_v46  ;;  %v2276_v54 = vmul.f32 %v2919_v46, %v2000_v17 }
0x1649   :  { %2265 = vrot.lane.b32.xlu1 %v2263_v48, %s3070_s19 }
0x16bb   :  { %v2266_v49 = vpop.permute.xlu1 %2265 }
0x16bc   :  { %v2268_v50 = vadd.f32 %v2266_v49, %v2174_v40 }
0x16be   :  { %2920 = vtanh.f32 %v2268_v50 }
0x16cb   :  { %v2921_v59 = vpop.eup %2920 }
0x16cc   :  { %2272 = vrot.lane.b32.xlu0 %v2921_v59, %s3073_s12 }
0x173e   :  { %v2273_v57 = vpop.permute.xlu0 %2272 }
0x173f   :  { %v2275_v18 = vmul.f32 %v2273_v57, %v2270_v56 }
0x1741   :  { %v2277_v60 = vadd.f32 %v2276_v54, %v2275_v18 }
0x1743   :  { %2290 = vrot.lane.b32.xlu1 %v2277_v60, %s3073_s12 }
0x17b5   :  { %v2291_v19 = vpop.permute.xlu1 %2290 }
0x17b6   :  { %2810 = vmatmul.mubr.msk.f32.vlgmr.msra.gmra.mxu1 %vm248_vm2, %v2291_v19 }
0x1876   :  { %v2360_v61 = vpop.f32.mrf.mxu1 }
0x1877   :  { %v2361_v20 = vadd.f32 %v2431_v21, %v2360_v61 }
0x1878   :  { %v2811_v22 = vpop.f32.mrf.mxu1 }
0x1879   :  { %2365 = vst.msk [vmem:[#allocation11] sm:$0x3] %vm2364_vm3, %v2361_v20 }
0x187a   :  { %3044 = shalt.err (!%p3041_p1)
}
0x187b   :  { %2375 = dma.vmem_to_hbm [thread:$0]  %s2373_s7, 32, %s3666_s9, [#allocation4]  }
0x187c   :  { %3059 = dma.done.wait [#allocation4], 32  }
0x187d   :  { %3060 = vsyncadd [#allocation4], 4294967264 }
0x187e   :  { %2379 = vsyncpa [#allocation3], 1 }
0x187f   :  { %2380 = vsyncpa [#allocation6], 1 }
0x1880   :  { %2381 = vsyncpa [#allocation9], 1 }
0x1881   :  { %2382 = vsyncpa [#allocation4], 1 }

</bundles_post_ra>
